<compile_context>
chip_gen: v6e
topology: v6e:2x2x1
jax: 0.10.0
libtpu: 0.0.40
codegen_flags: <defaults>
</compile_context>

<pallas_src>
import jax
import jax.numpy as jnp
from jax.experimental import pallas as pl
from jax.experimental.pallas import tpu as pltpu

IN_FEATURES = 832     # 13 planes * 8 * 8 (nn.Flatten)
HIDDEN1 = 512
HIDDEN2 = 256


def _round_up(n, m):
    return ((n + m - 1) // m) * m


def _mlp_kernel(x_ref, w1_ref, b1_ref, w2_ref, b2_ref, w3_ref, b3_ref, o_ref):
    """Fused 3-layer MLP for one batch tile.  x arrives f32 straight from HBM
    and is cast to bf16 in-kernel; bf16 MXU operands, f32 accumulate, f32
    bias-add / ReLU on the VPU."""
    x = x_ref[...].astype(jnp.bfloat16)                               # (bt, 832)
    h1 = jnp.dot(x, w1_ref[...], preferred_element_type=jnp.float32)
    h1 = jnp.maximum(h1 + b1_ref[...], 0.0)                           # f32 ReLU
    h2 = jnp.dot(h1.astype(jnp.bfloat16), w2_ref[...],
                 preferred_element_type=jnp.float32)
    h2 = jnp.maximum(h2 + b2_ref[...], 0.0)                           # f32 ReLU
    out = jnp.dot(h2.astype(jnp.bfloat16), w3_ref[...],
                  preferred_element_type=jnp.float32) + b3_ref[...]
    o_ref[...] = out.astype(o_ref.dtype)


def prepare_params(params):
    """One-time (load-time) parameter prep: transpose to (in, out), cast weights
    to bf16, pad the class dim to a lane-dense 128 multiple, reshape biases to
    broadcastable rows.  Kept OUT of the per-call path so jit'd serving does not
    redo these casts/pads/transposes on every invocation."""
    w1, b1, w2, b2, w3, b3 = params
    num_classes = w3.shape[0]
    C = _round_up(num_classes, 128)
    w1t = w1.T.astype(jnp.bfloat16)                                   # (832, 512)
    w2t = w2.T.astype(jnp.bfloat16)                                   # (512, 256)
    w3t = jnp.pad(w3.T.astype(jnp.bfloat16),
                  ((0, 0), (0, C - num_classes)))                     # (256, C)
    b1r = b1.astype(jnp.float32).reshape(1, -1)
    b2r = b2.astype(jnp.float32).reshape(1, -1)
    b3r = jnp.pad(b3.astype(jnp.float32),
                  (0, C - num_classes)).reshape(1, -1)                # (1, C)
    return (w1t, b1r, w2t, b2r, w3t, b3r), num_classes


def chess_move_classifier(x, prepared, num_classes, *, batch_tile=512,
                          out_dtype=jnp.float32, trim_classes=True):
    """x: (B, 13, 8, 8) float32 NCHW.  prepared: output of prepare_params.
    Returns logits (B, num_classes) in out_dtype (default float32)."""
    w1t, b1r, w2t, b2r, w3t, b3r = prepared
    C = w3t.shape[1]

    B = x.shape[0]
    x2d = x.reshape(B, -1).astype(jnp.float32)        # nn.Flatten (layout only)
    assert x2d.shape[1] == IN_FEATURES

    # --- batch tiling -------------------------------------------------------
    # Big tile (MXU full, few grid steps) but clamp for tiny batches.
    bt = _round_up(min(batch_tile, _round_up(B, 8)), 8)
    n_steps = pl.cdiv(B, bt)
    # v7x has 2 TensorCores and shards "parallel" grid axes across them: never
    # leave a large batch as a single grid step.
    if n_steps == 1 and B >= 16:
        bt = _round_up(pl.cdiv(B, 2), 8)
        n_steps = pl.cdiv(B, bt)
    grid = (n_steps,)

    # --- VMEM / cost budgeting ---------------------------------------------
    out_itemsize = jnp.dtype(out_dtype).itemsize
    weight_bytes = (IN_FEATURES * HIDDEN1 + HIDDEN1 * HIDDEN2 + HIDDEN2 * C) * 2
    bias_bytes = (HIDDEN1 + HIDDEN2 + C) * 4
    vmem_est = (2 * bt * IN_FEATURES * 4           # x tiles (double-buffered f32)
                + 2 * weight_bytes                 # resident bf16 weights (2x buf)
                + 2 * bias_bytes                   # resident f32 biases (2x buf)
                + 2 * bt * C * out_itemsize        # output tiles (double-buffered)
                + bt * (HIDDEN1 + HIDDEN2) * 4)    # f32 intermediates
    vmem_limit = int(min(128 << 20, 1.5 * vmem_est + (4 << 20)))

    flops = 2 * B * (IN_FEATURES * HIDDEN1 + HIDDEN1 * HIDDEN2 + HIDDEN2 * C)
    bytes_accessed = (B * IN_FEATURES * 4          # x (f32, read once, in-kernel cast)
                      + weight_bytes + bias_bytes
                      + B * C * out_itemsize)
    cost = pl.CostEstimate(flops=flops, transcendentals=0,
                           bytes_accessed=bytes_accessed)

    full = lambda i: (0, 0)   # weights/biases: same (whole) block every step

    out = pl.pallas_call(
        _mlp_kernel,
        out_shape=jax.ShapeDtypeStruct((B, C), out_dtype),
        grid_spec=pltpu.PrefetchScalarGridSpec(
            num_scalar_prefetch=0,
            grid=grid,
            in_specs=[
                pl.BlockSpec((bt, IN_FEATURES), lambda i: (i, 0)),
                pl.BlockSpec((IN_FEATURES, HIDDEN1), full),
                pl.BlockSpec((1, HIDDEN1), full),
                pl.BlockSpec((HIDDEN1, HIDDEN2), full),
                pl.BlockSpec((1, HIDDEN2), full),
                pl.BlockSpec((HIDDEN2, C), full),
                pl.BlockSpec((1, C), full),
            ],
            out_specs=pl.BlockSpec((bt, C), lambda i: (i, 0)),
        ),
        compiler_params=pltpu.CompilerParams(
            dimension_semantics=("parallel",),
            vmem_limit_bytes=vmem_limit,
        ),
        cost_estimate=cost,
    )(x2d, w1t, b1r, w2t, b2r, w3t, b3r)

    # Optional: consumers that can tolerate padded logits (e.g. masked argmax)
    # can pass trim_classes=False and skip this extra HBM copy.
    if trim_classes and C != num_classes:
        out = out[:, :num_classes]
    return out


def init_params(key, num_classes):
    """Deterministic init matching PyTorch Linear shapes: W (out, in), b (out,)."""
    ks = jax.random.split(key, 6)

    def linear(kw, kb, fan_in, fan_out):
        bound = 1.0 / jnp.sqrt(fan_in)
        w = jax.random.uniform(kw, (fan_out, fan_in), jnp.float32, -bound, bound)
        b = jax.random.uniform(kb, (fan_out,), jnp.float32, -bound, bound)
        return w, b

    w1, b1 = linear(ks[0], ks[1], IN_FEATURES, HIDDEN1)
    w2, b2 = linear(ks[2], ks[3], HIDDEN1, HIDDEN2)
    w3, b3 = linear(ks[4], ks[5], HIDDEN2, num_classes)
    return (w1, b1, w2, b2, w3, b3)


def reference_f32(x, params):
    w1, b1, w2, b2, w3, b3 = params
    h = x.reshape(x.shape[0], -1)
    h = jnp.maximum(h @ w1.T + b1, 0.0)
    h = jnp.maximum(h @ w2.T + b2, 0.0)
    return h @ w3.T + b3


def reference_bf16(x, params):
    """Matches the kernel's precision: bf16 matmul operands, f32 accumulate."""
    w1, b1, w2, b2, w3, b3 = params

    def mm(a, wt):
        return jnp.dot(a.astype(jnp.bfloat16), wt.astype(jnp.bfloat16),
                       preferred_element_type=jnp.float32)

    h = x.reshape(x.shape[0], -1)
    h = jnp.maximum(mm(h, w1.T) + b1, 0.0)
    h = jnp.maximum(mm(h, w2.T) + b2, 0.0)
    return mm(h, w3.T) + b3


if __name__ == "__main__":
    key = jax.random.PRNGKey(0)
    k_params, k_x1, k_x2 = jax.random.split(key, 3)

    num_classes = 72          # non-multiple of 128 to exercise class-dim padding
    params = init_params(k_params, num_classes)
    prepared, nc = prepare_params(params)

    # Case 1: tiny batch -> single (clamped) grid step.
    x1 = jax.random.normal(k_x1, (8, 13, 8, 8), jnp.float32)   # NCHW chess planes
    out1 = jax.block_until_ready(chess_move_classifier(x1, prepared, nc))
    assert out1.shape == (8, num_classes)

    # Case 2: multi-step grid with a ragged final batch tile (masking path).
    x2 = jax.random.normal(k_x2, (40, 13, 8, 8), jnp.float32)
    out2 = jax.block_until_ready(
        chess_move_classifier(x2, prepared, nc, batch_tile=16))
    assert out2.shape == (40, num_classes)

    for x, out in ((x1, out1), (x2, out2)):
        ref_bf16 = reference_bf16(x, params)
        ref_f32 = reference_f32(x, params)
        assert jnp.allclose(out, ref_bf16, atol=1e-2, rtol=1e-2), \
            "mismatch vs matching-precision (bf16 operand) JAX reference"
        assert jnp.max(jnp.abs(out - ref_f32)) < 5e-2, \
            "mismatch vs f32 JAX reference beyond bf16 tolerance"

    print("KERNEL_OK")
</pallas_src>

<mosaic_0001>
module attributes {stable_mosaic.version = 11 : i64} {
  func.func @_mlp_kernel(%arg0: i32, %arg1: memref<8x832xf32, #tpu.memory_space<vmem>>, %arg2: memref<832x512xbf16, #tpu.memory_space<vmem>>, %arg3: memref<1x512xf32, #tpu.memory_space<vmem>>, %arg4: memref<512x256xbf16, #tpu.memory_space<vmem>>, %arg5: memref<1x256xf32, #tpu.memory_space<vmem>>, %arg6: memref<256x128xbf16, #tpu.memory_space<vmem>>, %arg7: memref<1x128xf32, #tpu.memory_space<vmem>>, %arg8: memref<8x128xf32, #tpu.memory_space<vmem>>) attributes {dimension_semantics = [#tpu.dimension_semantics<parallel>], iteration_bounds = array<i64: 1>, scalar_prefetch = 0 : i64, scratch_operands = 0 : i64, tpu.core_type = #tpu.core_type<tc>, window_params = [{transform_indices = @transform_0, window_bounds = array<i64: 8, 832>}, {pipeline_mode = #tpu.pipeline_mode<synchronous>, transform_indices = @transform_1, window_bounds = array<i64: 832, 512>}, {pipeline_mode = #tpu.pipeline_mode<synchronous>, transform_indices = @transform_2, window_bounds = array<i64: 1, 512>}, {pipeline_mode = #tpu.pipeline_mode<synchronous>, transform_indices = @transform_3, window_bounds = array<i64: 512, 256>}, {pipeline_mode = #tpu.pipeline_mode<synchronous>, transform_indices = @transform_4, window_bounds = array<i64: 1, 256>}, {pipeline_mode = #tpu.pipeline_mode<synchronous>, transform_indices = @transform_5, window_bounds = array<i64: 256, 128>}, {pipeline_mode = #tpu.pipeline_mode<synchronous>, transform_indices = @transform_6, window_bounds = array<i64: 1, 128>}, {transform_indices = @transform_7, window_bounds = array<i64: 8, 128>}]} {
    %c0 = arith.constant 0 : index
    %c0_0 = arith.constant 0 : index
    %0 = vector.load %arg1[%c0, %c0_0] : memref<8x832xf32, #tpu.memory_space<vmem>>, vector<8x832xf32>
    %1 = arith.truncf %0 : vector<8x832xf32> to vector<8x832xbf16>
    %c0_1 = arith.constant 0 : index
    %c0_2 = arith.constant 0 : index
    %2 = vector.load %arg2[%c0_1, %c0_2] : memref<832x512xbf16, #tpu.memory_space<vmem>>, vector<832x512xbf16>
    %cst = arith.constant dense<0.000000e+00> : vector<8x512xf32>
    %3 = tpu.matmul %1, %2, %cst {dimension_numbers = #tpu.dot_dimension_numbers<[1], [0], [0], [1], [0, 0, 1, 1], [], []>} : vector<8x832xbf16>, vector<832x512xbf16>, vector<8x512xf32> -> vector<8x512xf32>
    %c0_3 = arith.constant 0 : index
    %c0_4 = arith.constant 0 : index
    %4 = vector.load %arg3[%c0_3, %c0_4] : memref<1x512xf32, #tpu.memory_space<vmem>>, vector<1x512xf32>
    %5 = vector.broadcast %4 : vector<1x512xf32> to vector<8x512xf32>
    %6 = arith.addf %3, %5 : vector<8x512xf32>
    %cst_5 = arith.constant 0.000000e+00 : f32
    %7 = vector.broadcast %cst_5 : f32 to vector<8x512xf32>
    %8 = arith.maximumf %6, %7 : vector<8x512xf32>
    %9 = arith.truncf %8 : vector<8x512xf32> to vector<8x512xbf16>
    %c0_6 = arith.constant 0 : index
    %c0_7 = arith.constant 0 : index
    %10 = vector.load %arg4[%c0_6, %c0_7] : memref<512x256xbf16, #tpu.memory_space<vmem>>, vector<512x256xbf16>
    %cst_8 = arith.constant dense<0.000000e+00> : vector<8x256xf32>
    %11 = tpu.matmul %9, %10, %cst_8 {dimension_numbers = #tpu.dot_dimension_numbers<[1], [0], [0], [1], [0, 0, 1, 1], [], []>} : vector<8x512xbf16>, vector<512x256xbf16>, vector<8x256xf32> -> vector<8x256xf32>
    %c0_9 = arith.constant 0 : index
    %c0_10 = arith.constant 0 : index
    %12 = vector.load %arg5[%c0_9, %c0_10] : memref<1x256xf32, #tpu.memory_space<vmem>>, vector<1x256xf32>
    %13 = vector.broadcast %12 : vector<1x256xf32> to vector<8x256xf32>
    %14 = arith.addf %11, %13 : vector<8x256xf32>
    %cst_11 = arith.constant 0.000000e+00 : f32
    %15 = vector.broadcast %cst_11 : f32 to vector<8x256xf32>
    %16 = arith.maximumf %14, %15 : vector<8x256xf32>
    %17 = arith.truncf %16 : vector<8x256xf32> to vector<8x256xbf16>
    %c0_12 = arith.constant 0 : index
    %c0_13 = arith.constant 0 : index
    %18 = vector.load %arg6[%c0_12, %c0_13] : memref<256x128xbf16, #tpu.memory_space<vmem>>, vector<256x128xbf16>
    %cst_14 = arith.constant dense<0.000000e+00> : vector<8x128xf32>
    %19 = tpu.matmul %17, %18, %cst_14 {dimension_numbers = #tpu.dot_dimension_numbers<[1], [0], [0], [1], [0, 0, 1, 1], [], []>} : vector<8x256xbf16>, vector<256x128xbf16>, vector<8x128xf32> -> vector<8x128xf32>
    %c0_15 = arith.constant 0 : index
    %c0_16 = arith.constant 0 : index
    %20 = vector.load %arg7[%c0_15, %c0_16] : memref<1x128xf32, #tpu.memory_space<vmem>>, vector<1x128xf32>
    %21 = vector.broadcast %20 : vector<1x128xf32> to vector<8x128xf32>
    %22 = arith.addf %19, %21 : vector<8x128xf32>
    %c0_17 = arith.constant 0 : index
    %c0_18 = arith.constant 0 : index
    %23 = vector.load %arg8[%c0_17, %c0_18] : memref<8x128xf32, #tpu.memory_space<vmem>>, vector<8x128xf32>
    tpu.vector_store %arg8[%c0_17, %c0_18], %22 {strides = array<i32>} : memref<8x128xf32, #tpu.memory_space<vmem>>, vector<8x128xf32>,
    return
  }
  func.func @transform_0(%arg0: i32) -> (i32, i32) {
    %c0_i32 = arith.constant 0 : i32
    %c0_i32_0 = arith.constant 0 : i32
    return %arg0, %c0_i32 : i32, i32
  }
  func.func @transform_1(%arg0: i32) -> (i32, i32) {
    %c0_i32 = arith.constant 0 : i32
    %c0_i32_0 = arith.constant 0 : i32
    %c0_i32_1 = arith.constant 0 : i32
    return %c0_i32, %c0_i32_0 : i32, i32
  }
  func.func @transform_2(%arg0: i32) -> (i32, i32) {
    %c0_i32 = arith.constant 0 : i32
    %c0_i32_0 = arith.constant 0 : i32
    %c0_i32_1 = arith.constant 0 : i32
    return %c0_i32, %c0_i32_0 : i32, i32
  }
  func.func @transform_3(%arg0: i32) -> (i32, i32) {
    %c0_i32 = arith.constant 0 : i32
    %c0_i32_0 = arith.constant 0 : i32
    %c0_i32_1 = arith.constant 0 : i32
    return %c0_i32, %c0_i32_0 : i32, i32
  }
  func.func @transform_4(%arg0: i32) -> (i32, i32) {
    %c0_i32 = arith.constant 0 : i32
    %c0_i32_0 = arith.constant 0 : i32
    %c0_i32_1 = arith.constant 0 : i32
    return %c0_i32, %c0_i32_0 : i32, i32
  }
  func.func @transform_5(%arg0: i32) -> (i32, i32) {
    %c0_i32 = arith.constant 0 : i32
    %c0_i32_0 = arith.constant 0 : i32
    %c0_i32_1 = arith.constant 0 : i32
    return %c0_i32, %c0_i32_0 : i32, i32
  }
  func.func @transform_6(%arg0: i32) -> (i32, i32) {
    %c0_i32 = arith.constant 0 : i32
    %c0_i32_0 = arith.constant 0 : i32
    %c0_i32_1 = arith.constant 0 : i32
    return %c0_i32, %c0_i32_0 : i32, i32
  }
  func.func @transform_7(%arg0: i32) -> (i32, i32) {
    %c0_i32 = arith.constant 0 : i32
    %c0_i32_0 = arith.constant 0 : i32
    return %arg0, %c0_i32 : i32, i32
  }
}

</mosaic_0001>

<bundles_post_ra>
// kernel: tpu_custom_call.1
= control target key start
LH: loop header
LB: loop body
LE: loop exit
PB: predicated region body
PF: predicated region fallthrough
CT: control target
= control target key end

     0   :  { %12 = vsyncpa [#allocation3], 0  ;;  %s3392_s0 = inlined_call_operand.hbm [shape: f32[8,832], index: 0, kind: input, shape index: {}]   ;;  %s3393_s1 = inlined_call_operand.hbm [shape: bf16[832,512], index: 1, kind: input, shape index: {}]   ;;  %s3394_s2 = inlined_call_operand.hbm [shape: f32[1,512], index: 2, kind: input, shape index: {}]   ;;  %s3395_s3 = inlined_call_operand.hbm [shape: bf16[512,256], index: 3, kind: input, shape index: {}]   ;;  %s3396_s4 = inlined_call_operand.vmem [shape: f32[1,256], index: 4, kind: input, shape index: {}]   ;;  %s3397_s5 = inlined_call_operand.hbm [shape: bf16[256,128], index: 5, kind: input, shape index: {}]   ;;  %s3398_s6 = inlined_call_operand.vmem [shape: f32[1,128], index: 6, kind: input, shape index: {}]   ;;  %s3399_s7 = inlined_call_operand.hbm [shape: f32[8,128], index: 7, kind: output, shape index: {}]  }
   0x1   :  { %13 = vsyncpa [#allocation6], 0 }
   0x2   :  { %14 = vsyncpa [#allocation9], 0 }
   0x3   :  { %15 = vsyncpa [#allocation4], 0  ;;  %s3269_s24 = smov [#allocation5]  }
   0x4   :  { %s31_s25 = sshll.u32 %s3269_s24, 4  ;;  %s32_s25 = int_to_ptr.vmem [resolvable:$true] %s31_s25 }
   0x5   :  { %s3149_s26 = scalar_lea.vmem %s32_s25, 26624  ;;  %p3154_p1 = scmp.lt.s32.totalorder %s32_s25, %s32_s25 }
   0x6   :  { %p3150_p0 = scmp.ne.s32.totalorder %s32_s25, %s3149_s26  ;;  %p3155_p2 = scmp.lt.s32.totalorder %s3149_s26, %s3149_s26 }
   0x8   :  { %p3156_p3 = por %p3155_p2, %p3154_p1 }
   0xa   :  { %p3157_p4 = pnand %p3156_p3, %p3150_p0 }
   0xc   :  { %3160 = shalt.err (!%p3157_p4)
}
   0xd   :  { %s3270_s27 = smov 256   ;;  %s3271_s28 = smov 16  }
   0xe   :  { %37 = dma.hbm_to_vmem [thread:$0]  %s3393_s1, 26624, %s32_s25, [#allocation6], %s3270_s27, %s3270_s27, %s3271_s28  }
   0xf   :  { %s3272_s8 = smov [#allocation8]  }
  0x10   :  { %s53_s9 = sshll.u32 %s3272_s8, 4  ;;  %s54_s9 = int_to_ptr.vmem [resolvable:$true] %s53_s9 }
  0x11   :  { %s3169_s10 = scalar_lea.vmem %s54_s9, 8192  ;;  %p3174_p6 = scmp.lt.s32.totalorder %s54_s9, %s54_s9 }
  0x12   :  { %p3170_p5 = scmp.ne.s32.totalorder %s54_s9, %s3169_s10  ;;  %p3175_p7 = scmp.lt.s32.totalorder %s3169_s10, %s3169_s10 }
  0x14   :  { %p3176_p8 = por %p3175_p7, %p3174_p6 }
  0x16   :  { %p3177_p9 = pnand %p3176_p8, %p3170_p5 }
  0x18   :  { %3180 = shalt.err (!%p3177_p9)
}
  0x19   :  { %s3273_s11 = smov 128   ;;  %s3274_s12 = smov 8  }
  0x1a   :  { %59 = dma.hbm_to_vmem [thread:$0]  %s3395_s3, 8192, %s54_s9, [#allocation9], %s3273_s11, %s3273_s11, %s3274_s12  }
  0x1b   :  { %s3275_s15 = smov [#allocation2]   ;;  %s3276_s17 = smov [#allocation7]  }
  0x1c   :  { %s22_s16 = sshll.u32 %s3275_s15, 4  ;;  %s44_s1 = sshll.u32 %s3276_s17, 4  ;;  %s23_s16 = int_to_ptr.vmem [resolvable:$true] %s22_s16  ;;  %s45_s1 = int_to_ptr.vmem [resolvable:$true] %s44_s1 }
  0x1d   :  { %s3189_s18 = scalar_lea.vmem %s23_s16, 896  ;;  %p3194_p11 = scmp.lt.s32.totalorder %s23_s16, %s23_s16 }
  0x1e   :  { %p3190_p10 = scmp.ne.s32.totalorder %s23_s16, %s3189_s18  ;;  %p3195_p12 = scmp.lt.s32.totalorder %s3189_s18, %s3189_s18 }
  0x20   :  { %p3196_p13 = por %p3195_p12, %p3194_p11 }
  0x22   :  { %p3197_p0 = pnand %p3196_p13, %p3190_p10 }
  0x24   :  { %3200 = shalt.err (!%p3197_p0)
}
  0x25   :  { %25 = dma.hbm_to_vmem [thread:$0]  %s3392_s0, 896, %s23_s16, [#allocation3]  }
  0x26   :  { %s3209_s21 = scalar_lea.vmem %s45_s1, 64  ;;  %p3214_p2 = scmp.lt.s32.totalorder %s45_s1, %s45_s1 }
  0x27   :  { %p3210_p1 = scmp.ne.s32.totalorder %s45_s1, %s3209_s21  ;;  %p3215_p3 = scmp.lt.s32.totalorder %s3209_s21, %s3209_s21 }
  0x29   :  { %p3216_p4 = por %p3215_p3, %p3214_p2 }
  0x2b   :  { %p3217_p5 = pnand %p3216_p4, %p3210_p1 }
  0x2d   :  { %3220 = shalt.err (!%p3217_p5)
}
  0x2e   :  { %47 = dma.hbm_to_vmem [thread:$0]  %s3394_s2, 64, %s45_s1, [#allocation6]  }
  0x2f   :  { %s3277_s23 = smov [#allocation10]  }
  0x30   :  { %s67_s24 = sshll.u32 %s3277_s23, 4  ;;  %s68_s24 = int_to_ptr.vmem [resolvable:$true] %s67_s24 }
  0x31   :  { %s3229_s25 = scalar_lea.vmem %s68_s24, 2048  ;;  %p3234_p7 = scmp.lt.s32.totalorder %s68_s24, %s68_s24 }
  0x32   :  { %p3230_p6 = scmp.ne.s32.totalorder %s68_s24, %s3229_s25  ;;  %p3235_p8 = scmp.lt.s32.totalorder %s3229_s25, %s3229_s25 }
  0x34   :  { %p3236_p9 = por %p3235_p8, %p3234_p7 }
  0x36   :  { %p3237_p10 = pnand %p3236_p9, %p3230_p6 }
  0x38   :  { %3240 = shalt.err (!%p3237_p10)
}
  0x39   :  { %s3278_s0 = smov 64   ;;  %s3279_s26 = smov 4  }
  0x3a   :  { %73 = dma.hbm_to_vmem [thread:$0]  %s3397_s5, 2048, %s68_s24, [#allocation9], %s3278_s0, %s3278_s0, %s3279_s26  }
  0x3b   :  { %3261 = dma.done.wait [#allocation3], 896  }
  0x3c   :  { %3262 = vsyncadd [#allocation3], 4294966400 }
  0x3d   :  { %3263 = dma.done.wait [#allocation6], 26688  }
  0x3e   :  { %3264 = vsyncadd [#allocation6], 4294940608 }
  0x3f   :  { %3265 = dma.done.wait [#allocation9], 10240  }
  0x40   :  { %3266 = vsyncadd [#allocation9], 4294957056  ;;  %v2717_v0 = vld [vmem:[#allocation5 + $0xe4] ss:$16 sps:$4 sm:$0xff]   ;;  %v2721_v2 = vld [vmem:[#allocation5 + $0xe0] ss:$16 sps:$4 sm:$0xff]  }
  0x41   :  { %v2719_v1 = vld [vmem:[#allocation5 + $0x2e4] ss:$16 sps:$4 sm:$0xff]   ;;  %1380 = vmatprep.subr.bf16.mxu0 %v2717_v0  ;;  %v2722_v3 = vld [vmem:[#allocation5 + $0x2e0] ss:$16 sps:$4 sm:$0xff]   ;;  %vm1376_vm0 = vcmask 523264   ;;  %s3281_s30 = smov [#allocation11]  }
  0x42   :  { %1421 = vmatprep.subr.bf16.mxu1 %v2719_v1  ;;  %v2723_v4 = vld [vmem:[#allocation5 + $0xc4] ss:$16 sps:$4 sm:$0xff]   ;;  %1381 = vmatpush1.bf16.msra.mxu0 %v2721_v2  ;;  %v2727_v6 = vld [vmem:[#allocation5 + $0xc0] ss:$16 sps:$4 sm:$0xff]   ;;  %s2380_s8 = sshll.u32 %s3281_s30, 4  ;;  %s2381_s8 = int_to_ptr.vmem [resolvable:$true] %s2380_s8 }
  0x43   :  { %1422 = vmatpush1.bf16.msra.mxu1 %v2722_v3  ;;  %v2725_v5 = vld [vmem:[#allocation5 + $0x2c4] ss:$16 sps:$4 sm:$0xff]   ;;  %1382 = vmatprep.subr.bf16.mxu0 %v2723_v4  ;;  %v2728_v7 = vld [vmem:[#allocation5 + $0x2c0] ss:$16 sps:$4 sm:$0xff]   ;;  %v92_v4 = vld [vmem:[#allocation2] sm:$0xff]  ;;  %s3241_s9 = scalar_lea.vmem %s2381_s8, 128  ;;  %p3246_p12 = scmp.lt.s32.totalorder %s2381_s8, %s2381_s8 }
  0x44   :  { %1423 = vmatprep.subr.bf16.mxu1 %v2725_v5  ;;  %v2729_v8 = vld [vmem:[#allocation5 + $0xa4] ss:$16 sps:$4 sm:$0xff]   ;;  %v2733_v10 = vld [vmem:[#allocation5 + $0xa0] ss:$16 sps:$4 sm:$0xff]   ;;  %v94_v5 = vld [vmem:[#allocation2 + $0x10] sm:$0xff]  ;;  %p3242_p11 = scmp.ne.s32.totalorder %s2381_s8, %s3241_s9  ;;  %p3247_p13 = scmp.lt.s32.totalorder %s3241_s9, %s3241_s9 }
  0x45   :  { %v2731_v9 = vld [vmem:[#allocation5 + $0x2a4] ss:$16 sps:$4 sm:$0xff]   ;;  %v2734_v11 = vld [vmem:[#allocation5 + $0x2a0] ss:$16 sps:$4 sm:$0xff]  }
  0x46   :  { %1383 = vmatpush1.bf16.msra.mxu0 %v2727_v6  ;;  %v2735_v12 = vld [vmem:[#allocation5 + $0x84] ss:$16 sps:$4 sm:$0xff]   ;;  %v2739_v14 = vld [vmem:[#allocation5 + $0x80] ss:$16 sps:$4 sm:$0xff]   ;;  %p3248_p0 = por %p3247_p13, %p3246_p12 }
  0x47   :  { %1424 = vmatpush1.bf16.msra.mxu1 %v2728_v7  ;;  %1384 = vmatprep.subr.bf16.mxu0 %v2729_v8  ;;  %v2737_v13 = vld [vmem:[#allocation5 + $0x284] ss:$16 sps:$4 sm:$0xff]   ;;  %v2740_v15 = vld [vmem:[#allocation5 + $0x280] ss:$16 sps:$4 sm:$0xff]   ;;  %v3343_v8 = vpack.c.bf16 %v92_v4, %v92_v4 }
  0x48   :  { %1425 = vmatprep.subr.bf16.mxu1 %v2731_v9  ;;  %v2741_v16 = vld [vmem:[#allocation5 + $0x64] ss:$16 sps:$4 sm:$0xff]   ;;  %v2745_v18 = vld [vmem:[#allocation5 + $0x60] ss:$16 sps:$4 sm:$0xff]   ;;  %v3345_v9 = vpack.c.bf16 %v94_v5, %v94_v5  ;;  %v2894_v5 = vld [vmem:[#allocation5 + $0x1c8] ss:$16 sps:$4 sm:$0xff]   ;;  %p3249_p1 = pnand %p3248_p0, %p3242_p11 }
  0x49   :  { %v2743_v17 = vld [vmem:[#allocation5 + $0x264] ss:$16 sps:$4 sm:$0xff]   ;;  %v2746_v19 = vld [vmem:[#allocation5 + $0x260] ss:$16 sps:$4 sm:$0xff]  }
  0x4a   :  { %1385 = vmatpush1.bf16.msra.mxu0 %v2733_v10  ;;  %v2747_v20 = vld [vmem:[#allocation5 + $0x44] ss:$16 sps:$4 sm:$0xff]   ;;  %v2751_v22 = vld [vmem:[#allocation5 + $0x40] ss:$16 sps:$4 sm:$0xff]  }
  0x4b   :  { %1426 = vmatpush1.bf16.msra.mxu1 %v2734_v11  ;;  %1386 = vmatprep.subr.bf16.mxu0 %v2735_v12  ;;  %v2749_v21 = vld [vmem:[#allocation5 + $0x244] ss:$16 sps:$4 sm:$0xff]   ;;  %v2752_v23 = vld [vmem:[#allocation5 + $0x240] ss:$16 sps:$4 sm:$0xff]  }
  0x4c   :  { %1427 = vmatprep.subr.bf16.mxu1 %v2737_v13  ;;  %v2753_v24 = vld [vmem:[#allocation5 + $0x24] ss:$16 sps:$4 sm:$0xff]   ;;  %v2757_v26 = vld [vmem:[#allocation5 + $0x20] ss:$16 sps:$4 sm:$0xff]  }
  0x4d   :  { %v2755_v25 = vld [vmem:[#allocation5 + $0x224] ss:$16 sps:$4 sm:$0xff]   ;;  %v2758_v27 = vld [vmem:[#allocation5 + $0x220] ss:$16 sps:$4 sm:$0xff]  }
  0x4e   :  { %1387 = vmatpush1.bf16.msra.mxu0 %v2739_v14  ;;  %v2759_v28 = vld [vmem:[#allocation5 + $0x4] ss:$16 sps:$4 sm:$0xff]   ;;  %v2763_v30 = vld [vmem:[#allocation5] ss:$16 sps:$4 sm:$0xff]  }
  0x4f   :  { %1428 = vmatpush1.bf16.msra.mxu1 %v2740_v15  ;;  %1388 = vmatprep.subr.bf16.mxu0 %v2741_v16  ;;  %v2761_v29 = vld [vmem:[#allocation5 + $0x204] ss:$16 sps:$4 sm:$0xff]   ;;  %v2764_v31 = vld [vmem:[#allocation5 + $0x200] ss:$16 sps:$4 sm:$0xff]  }
  0x50   :  { %1429 = vmatprep.subr.bf16.mxu1 %v2743_v17  ;;  %v2765_v32 = vld [vmem:[#allocation5 + $0x1e4] ss:$16 sps:$4 sm:$0xff]   ;;  %v2769_v34 = vld [vmem:[#allocation5 + $0x1e0] ss:$16 sps:$4 sm:$0xff]  }
  0x51   :  { %v2767_v33 = vld [vmem:[#allocation5 + $0x3e4] ss:$16 sps:$4 sm:$0xff]   ;;  %v2770_v35 = vld [vmem:[#allocation5 + $0x3e0] ss:$16 sps:$4 sm:$0xff]  }
  0x52   :  { %1389 = vmatpush1.bf16.msra.mxu0 %v2745_v18  ;;  %v2771_v36 = vld [vmem:[#allocation5 + $0x1c4] ss:$16 sps:$4 sm:$0xff]   ;;  %v2775_v38 = vld [vmem:[#allocation5 + $0x1c0] ss:$16 sps:$4 sm:$0xff]   ;;  %v3280_v18 = vmov 0  }
  0x53   :  { %1430 = vmatpush1.bf16.msra.mxu1 %v2746_v19  ;;  %1390 = vmatprep.subr.bf16.mxu0 %v2747_v20  ;;  %v2773_v37 = vld [vmem:[#allocation5 + $0x3c4] ss:$16 sps:$4 sm:$0xff]   ;;  %v2776_v39 = vld [vmem:[#allocation5 + $0x3c0] ss:$16 sps:$4 sm:$0xff]  }
  0x54   :  { %1431 = vmatprep.subr.bf16.mxu1 %v2749_v21  ;;  %v2777_v40 = vld [vmem:[#allocation5 + $0x1a4] ss:$16 sps:$4 sm:$0xff]   ;;  %v2781_v42 = vld [vmem:[#allocation5 + $0x1a0] ss:$16 sps:$4 sm:$0xff]  }
  0x55   :  { %v2779_v41 = vld [vmem:[#allocation5 + $0x3a4] ss:$16 sps:$4 sm:$0xff]   ;;  %v2782_v43 = vld [vmem:[#allocation5 + $0x3a0] ss:$16 sps:$4 sm:$0xff]  }
  0x56   :  { %1391 = vmatpush1.bf16.msra.mxu0 %v2751_v22  ;;  %v2783_v44 = vld [vmem:[#allocation5 + $0x184] ss:$16 sps:$4 sm:$0xff]   ;;  %v2787_v47 = vld [vmem:[#allocation5 + $0x180] ss:$16 sps:$4 sm:$0xff]  }
  0x57   :  { %1432 = vmatpush1.bf16.msra.mxu1 %v2752_v23  ;;  %1392 = vmatprep.subr.bf16.mxu0 %v2753_v24  ;;  %v2785_v45 = vld [vmem:[#allocation5 + $0x384] ss:$16 sps:$4 sm:$0xff]   ;;  %v2788_v48 = vld [vmem:[#allocation5 + $0x380] ss:$16 sps:$4 sm:$0xff]  }
  0x58   :  { %1433 = vmatprep.subr.bf16.mxu1 %v2755_v25  ;;  %v93_v46 = vld [vmem:[#allocation2 + $0x8] sm:$0xff]  ;;  %v95_v50 = vld [vmem:[#allocation2 + $0x18] sm:$0xff]  ;;  %v98_v25 = vld [vmem:[#allocation2 + $0x30] sm:$0xff] }
  0x59   :  { %v3337_v49 = vpack.c.bf16 %v93_v46, %v93_v46  ;;  %v2789_v51 = vld [vmem:[#allocation5 + $0x164] ss:$16 sps:$4 sm:$0xff]   ;;  %v3339_v52 = vpack.c.bf16 %v95_v50, %v95_v50  ;;  %v2793_v54 = vld [vmem:[#allocation5 + $0x160] ss:$16 sps:$4 sm:$0xff]   ;;  %v2866_v46 = vld [vmem:[#allocation5 + $0x6c] ss:$16 sps:$4 sm:$0xff]  }
  0x5a   :  { %1393 = vmatpush1.bf16.msra.mxu0 %v2757_v26  ;;  %v2791_v53 = vld [vmem:[#allocation5 + $0x364] ss:$16 sps:$4 sm:$0xff]   ;;  %v2794_v55 = vld [vmem:[#allocation5 + $0x360] ss:$16 sps:$4 sm:$0xff]   ;;  %v2872_v50 = vld [vmem:[#allocation5 + $0x4c] ss:$16 sps:$4 sm:$0xff]  }
  0x5b   :  { %1434 = vmatpush1.bf16.msra.mxu1 %v2758_v27  ;;  %1394 = vmatprep.subr.bf16.mxu0 %v2759_v28  ;;  %v2795_v56 = vld [vmem:[#allocation5 + $0x144] ss:$16 sps:$4 sm:$0xff]   ;;  %v2799_v58 = vld [vmem:[#allocation5 + $0x140] ss:$16 sps:$4 sm:$0xff]   ;;  %v2842_v27 = vld [vmem:[#allocation5 + $0xec] ss:$16 sps:$4 sm:$0xff]  }
  0x5c   :  { %1435 = vmatprep.subr.bf16.mxu1 %v2761_v29  ;;  %1412 = vmatprep.mubr.bf16.mxu0 %v3337_v49  ;;  %v2797_v57 = vld [vmem:[#allocation5 + $0x344] ss:$16 sps:$4 sm:$0xff]   ;;  %v2800_v59 = vld [vmem:[#allocation5 + $0x340] ss:$16 sps:$4 sm:$0xff]   ;;  %v3350_v29 = vpack.c.bf16 %v98_v25, %v98_v25  ;;  %v2915_v25 = vld [vmem:[#allocation5 + $0x148] ss:$16 sps:$4 sm:$0xff]  }
  0x5d   :  { %1453 = vmatprep.mubr.bf16.mxu1 %v3339_v52  ;;  %v2801_v60 = vld [vmem:[#allocation5 + $0x124] ss:$16 sps:$4 sm:$0xff]   ;;  %v2805_v62 = vld [vmem:[#allocation5 + $0x120] ss:$16 sps:$4 sm:$0xff]  }
  0x5e   :  { %1395 = vmatpush1.bf16.msra.mxu0 %v2763_v30  ;;  %v2803_v61 = vld [vmem:[#allocation5 + $0x324] ss:$16 sps:$4 sm:$0xff]   ;;  %v2806_v63 = vld [vmem:[#allocation5 + $0x320] ss:$16 sps:$4 sm:$0xff]   ;;  %v2840_v30 = vld [vmem:[#allocation5 + $0xe8] ss:$16 sps:$4 sm:$0xff]  }
  0x5f   :  { %1436 = vmatpush1.bf16.msra.mxu1 %v2764_v31  ;;  %1396 = vmatprep.subr.bf16.mxu0 %v2765_v32  ;;  %v2807_v0 = vld [vmem:[#allocation5 + $0x104] ss:$16 sps:$4 sm:$0xff]   ;;  %v2811_v2 = vld [vmem:[#allocation5 + $0x100] ss:$16 sps:$4 sm:$0xff]   ;;  %v2848_v32 = vld [vmem:[#allocation5 + $0xcc] ss:$16 sps:$4 sm:$0xff]  }
  0x60   :  { %1437 = vmatprep.subr.bf16.mxu1 %v2767_v33  ;;  %v2809_v1 = vld [vmem:[#allocation5 + $0x304] ss:$16 sps:$4 sm:$0xff]   ;;  %v2812_v3 = vld [vmem:[#allocation5 + $0x300] ss:$16 sps:$4 sm:$0xff]  }
  0x61   :  { %v2815_v6 = vld [vmem:[#allocation5 + $0x4e4] ss:$16 sps:$4 sm:$0xff]   ;;  %v2813_v10 = vld [vmem:[#allocation5 + $0x4e0] ss:$16 sps:$4 sm:$0xff]  }
  0x62   :  { %1397 = vmatpush2.bf16.msra.mxu0 %v2769_v34  ;;  %v2818_v7 = vld [vmem:[#allocation5 + $0x664] ss:$16 sps:$4 sm:$0xff]   ;;  %v2816_v11 = vld [vmem:[#allocation5 + $0x660] ss:$16 sps:$4 sm:$0xff]   ;;  %v2846_v34 = vld [vmem:[#allocation5 + $0xc8] ss:$16 sps:$4 sm:$0xff]  }
  0x63   :  { %1438 = vmatpush2.bf16.msra.mxu1 %v2770_v35  ;;  %1398 = vmatprep.subr.bf16.mxu0 %v2771_v36  ;;  %v2821_v12 = vld [vmem:[#allocation5 + $0x4c4] ss:$16 sps:$4 sm:$0xff]   ;;  %v2819_v14 = vld [vmem:[#allocation5 + $0x4c0] ss:$16 sps:$4 sm:$0xff]   ;;  %v2854_v36 = vld [vmem:[#allocation5 + $0xac] ss:$16 sps:$4 sm:$0xff]  }
  0x64   :  { %1439 = vmatprep.subr.bf16.mxu1 %v2773_v37  ;;  %v2824_v13 = vld [vmem:[#allocation5 + $0x644] ss:$16 sps:$4 sm:$0xff]   ;;  %v2822_v15 = vld [vmem:[#allocation5 + $0x640] ss:$16 sps:$4 sm:$0xff]  }
  0x65   :  { %v2827_v16 = vld [vmem:[#allocation5 + $0x4a4] ss:$16 sps:$4 sm:$0xff]   ;;  %v2825_v19 = vld [vmem:[#allocation5 + $0x4a0] ss:$16 sps:$4 sm:$0xff]  }
  0x66   :  { %1399 = vmatpush2.bf16.msra.mxu0 %v2775_v38  ;;  %v2830_v17 = vld [vmem:[#allocation5 + $0x624] ss:$16 sps:$4 sm:$0xff]   ;;  %v2828_v20 = vld [vmem:[#allocation5 + $0x620] ss:$16 sps:$4 sm:$0xff]  }
  0x67   :  { %1440 = vmatpush2.bf16.msra.mxu1 %v2776_v39  ;;  %1400 = vmatprep.subr.bf16.mxu0 %v2777_v40  ;;  %v2833_v21 = vld [vmem:[#allocation5 + $0x484] ss:$16 sps:$4 sm:$0xff]   ;;  %v2831_v23 = vld [vmem:[#allocation5 + $0x480] ss:$16 sps:$4 sm:$0xff]   ;;  %v2852_v39 = vld [vmem:[#allocation5 + $0xa8] ss:$16 sps:$4 sm:$0xff]  }
  0x68   :  { %1441 = vmatprep.subr.bf16.mxu1 %v2779_v41  ;;  %v2836_v22 = vld [vmem:[#allocation5 + $0x604] ss:$16 sps:$4 sm:$0xff]   ;;  %v2834_v24 = vld [vmem:[#allocation5 + $0x600] ss:$16 sps:$4 sm:$0xff]  }
  0x69   :  { %v2839_v26 = vld [vmem:[#allocation5 + $0x464] ss:$16 sps:$4 sm:$0xff]   ;;  %v2837_v28 = vld [vmem:[#allocation5 + $0x460] ss:$16 sps:$4 sm:$0xff]  }
  0x6a   :  { %1401 = vmatpush2.bf16.msra.mxu0 %v2781_v42  ;;  %v2845_v31 = vld [vmem:[#allocation5 + $0x444] ss:$16 sps:$4 sm:$0xff]   ;;  %v2843_v33 = vld [vmem:[#allocation5 + $0x440] ss:$16 sps:$4 sm:$0xff]   ;;  %v2860_v42 = vld [vmem:[#allocation5 + $0x8c] ss:$16 sps:$4 sm:$0xff]  }
  0x6b   :  { %1442 = vmatpush2.bf16.msra.mxu1 %v2782_v43  ;;  %1402 = vmatprep.subr.bf16.mxu0 %v2783_v44  ;;  %v2851_v35 = vld [vmem:[#allocation5 + $0x424] ss:$16 sps:$4 sm:$0xff]   ;;  %v2849_v37 = vld [vmem:[#allocation5 + $0x420] ss:$16 sps:$4 sm:$0xff]   ;;  %v2858_v44 = vld [vmem:[#allocation5 + $0x88] ss:$16 sps:$4 sm:$0xff]  }
  0x6c   :  { %1443 = vmatprep.subr.bf16.mxu1 %v2785_v45  ;;  %v97_v38 = vld [vmem:[#allocation2 + $0x28] sm:$0xff] }
  0x6d   :  { %v2857_v40 = vld [vmem:[#allocation5 + $0x404] ss:$16 sps:$4 sm:$0xff]   ;;  %v3355_v41 = vpack.c.bf16 %v97_v38, %v97_v38  ;;  %v2855_v43 = vld [vmem:[#allocation5 + $0x400] ss:$16 sps:$4 sm:$0xff]   ;;  %v2933_v38 = vld [vmem:[#allocation5 + $0x268] ss:$16 sps:$4 sm:$0xff]  }
  0x6e   :  { %1403 = vmatpush2.bf16.msra.mxu0 %v2787_v47  ;;  %v2863_v45 = vld [vmem:[#allocation5 + $0x5e4] ss:$16 sps:$4 sm:$0xff]   ;;  %v2861_v47 = vld [vmem:[#allocation5 + $0x5e0] ss:$16 sps:$4 sm:$0xff]  }
  0x6f   :  { %1444 = vmatpush2.bf16.msra.mxu1 %v2788_v48  ;;  %1404 = vmatprep.subr.bf16.mxu0 %v2789_v51  ;;  %v2864_v48 = vld [vmem:[#allocation5 + $0x68] ss:$16 sps:$4 sm:$0xff]   ;;  %v2867_v51 = vld [vmem:[#allocation5 + $0x5c0] ss:$16 sps:$4 sm:$0xff]  }
  0x70   :  { %1445 = vmatprep.subr.bf16.mxu1 %v2791_v53  ;;  %v2870_v53 = vld [vmem:[#allocation5 + $0x48] ss:$16 sps:$4 sm:$0xff]   ;;  %v2891_v4 = vld [vmem:[#allocation5 + $0x540] ss:$16 sps:$4 sm:$0xff]  }
  0x72   :  { %1405 = vmatpush2.bf16.msra.mxu0 %v2793_v54  ;;  %v2875_v54 = vld [vmem:[#allocation5 + $0x5a4] ss:$16 sps:$4 sm:$0xff]  }
  0x73   :  { %1446 = vmatpush2.bf16.msra.mxu1 %v2794_v55  ;;  %1406 = vmatprep.subr.bf16.mxu0 %v2795_v56  ;;  %v2878_v55 = vld [vmem:[#allocation5 + $0x2c] ss:$16 sps:$4 sm:$0xff]   ;;  %v2873_v56 = vld [vmem:[#allocation5 + $0x5a0] ss:$16 sps:$4 sm:$0xff]  }
  0x74   :  { %1447 = vmatprep.subr.bf16.mxu1 %v2797_v57  ;;  %v2876_v57 = vld [vmem:[#allocation5 + $0x28] ss:$16 sps:$4 sm:$0xff]  }
  0x76   :  { %1407 = vmatpush2.bf16.msra.mxu0 %v2799_v58  ;;  %v2881_v58 = vld [vmem:[#allocation5 + $0x584] ss:$16 sps:$4 sm:$0xff]  }
  0x77   :  { %1448 = vmatpush2.bf16.msra.mxu1 %v2800_v59  ;;  %1408 = vmatprep.subr.bf16.mxu0 %v2801_v60  ;;  %v2884_v59 = vld [vmem:[#allocation5 + $0xc] ss:$16 sps:$4 sm:$0xff]   ;;  %v2879_v60 = vld [vmem:[#allocation5 + $0x580] ss:$16 sps:$4 sm:$0xff]  }
  0x78   :  { %1449 = vmatprep.subr.bf16.mxu1 %v2803_v61  ;;  %v2882_v61 = vld [vmem:[#allocation5 + $0x8] ss:$16 sps:$4 sm:$0xff]  }
  0x7a   :  { %1409 = vmatpush2.bf16.msra.mxu0 %v2805_v62  ;;  %v2887_v62 = vld [vmem:[#allocation5 + $0x564] ss:$16 sps:$4 sm:$0xff]  }
  0x7b   :  { %1450 = vmatpush2.bf16.msra.mxu1 %v2806_v63  ;;  %1410 = vmatprep.subr.bf16.mxu0 %v2807_v0  ;;  %v2890_v63 = vld [vmem:[#allocation5 + $0x1ec] ss:$16 sps:$4 sm:$0xff]   ;;  %v2885_v0 = vld [vmem:[#allocation5 + $0x560] ss:$16 sps:$4 sm:$0xff]  }
  0x7c   :  { %1451 = vmatprep.subr.bf16.mxu1 %v2809_v1  ;;  %v2888_v1 = vld [vmem:[#allocation5 + $0x1e8] ss:$16 sps:$4 sm:$0xff]  }
  0x7e   :  { %1411 = vmatpush2.bf16.msra.mxu0 %v2811_v2  ;;  %v2893_v2 = vld [vmem:[#allocation5 + $0x544] ss:$16 sps:$4 sm:$0xff]  }
  0x7f   :  { %1452 = vmatpush2.bf16.msra.mxu1 %v2812_v3  ;;  %1462 = vmatprep.subr.bf16.mxu0 %v2815_v6  ;;  %v2896_v3 = vld [vmem:[#allocation5 + $0x1cc] ss:$16 sps:$4 sm:$0xff]   ;;  %v2899_v6 = vld [vmem:[#allocation5 + $0x524] ss:$16 sps:$4 sm:$0xff]  }
  0x80   :  { %1511 = vmatprep.subr.bf16.mxu1 %v2818_v7  ;;  %v2902_v7 = vld [vmem:[#allocation5 + $0x1ac] ss:$16 sps:$4 sm:$0xff]  }
  0x81   :  { %1413 = vmatmul.mubr.bf16.vlgmr.msra.gmra.mxu0 %v3343_v8 }
  0x82   :  { %1454 = vmatmul.mubr.bf16.vlgmr.msra.gmra.mxu1 %v3345_v9  ;;  %1463 = vmatpush1.bf16.msra.mxu0 %v2813_v10  ;;  %v2897_v10 = vld [vmem:[#allocation5 + $0x520] ss:$16 sps:$4 sm:$0xff]  }
  0x83   :  { %1512 = vmatpush1.bf16.msra.mxu1 %v2816_v11  ;;  %1464 = vmatprep.subr.bf16.mxu0 %v2821_v12  ;;  %v2900_v11 = vld [vmem:[#allocation5 + $0x1a8] ss:$16 sps:$4 sm:$0xff]   ;;  %v2905_v12 = vld [vmem:[#allocation5 + $0x504] ss:$16 sps:$4 sm:$0xff]  }
  0x84   :  { %1513 = vmatprep.subr.bf16.mxu1 %v2824_v13  ;;  %1535 = vmatprep.mubr.bf16.mxu1 %v3280_v18  ;;  %v2908_v13 = vld [vmem:[#allocation5 + $0x18c] ss:$16 sps:$4 sm:$0xff]  }
  0x85   :  { %1494 = vmatprep.mubr.bf16.mxu0 %v3355_v41 }
  0x86   :  { %1465 = vmatpush1.bf16.msra.mxu0 %v2819_v14  ;;  %v2903_v14 = vld [vmem:[#allocation5 + $0x500] ss:$16 sps:$4 sm:$0xff]  }
  0x87   :  { %1514 = vmatpush1.bf16.msra.mxu1 %v2822_v15  ;;  %1466 = vmatprep.subr.bf16.mxu0 %v2827_v16  ;;  %v2906_v15 = vld [vmem:[#allocation5 + $0x188] ss:$16 sps:$4 sm:$0xff]  }
  0x88   :  { %1515 = vmatprep.subr.bf16.mxu1 %v2830_v17  ;;  %v96_v16 = vld [vmem:[#allocation2 + $0x20] sm:$0xff] }
  0x89   :  { %v2911_v17 = vld [vmem:[#allocation5 + $0x16c] ss:$16 sps:$4 sm:$0xff]  }
  0x8a   :  { %1467 = vmatpush1.bf16.msra.mxu0 %v2825_v19  ;;  %v2914_v19 = vld [vmem:[#allocation5 + $0x2ec] ss:$16 sps:$4 sm:$0xff]  }
  0x8b   :  { %1516 = vmatpush1.bf16.msra.mxu1 %v2828_v20  ;;  %1468 = vmatprep.subr.bf16.mxu0 %v2833_v21  ;;  %v3358_v20 = vpack.c.bf16 %v96_v16, %v96_v16  ;;  %v2909_v21 = vld [vmem:[#allocation5 + $0x168] ss:$16 sps:$4 sm:$0xff]  }
  0x8c   :  { %1517 = vmatprep.subr.bf16.mxu1 %v2836_v22  ;;  %v2912_v22 = vld [vmem:[#allocation5 + $0x2e8] ss:$16 sps:$4 sm:$0xff]  }
  0x8d   :  { %v2996_v16 = vld [vmem:[#allocation5 + $0x5a8] ss:$16 sps:$4 sm:$0xff]  }
  0x8e   :  { %1469 = vmatpush1.bf16.msra.mxu0 %v2831_v23  ;;  %v2917_v23 = vld [vmem:[#allocation5 + $0x14c] ss:$16 sps:$4 sm:$0xff]  }
  0x8f   :  { %1518 = vmatpush1.bf16.msra.mxu1 %v2834_v24  ;;  %1470 = vmatprep.subr.bf16.mxu0 %v2839_v26  ;;  %v2920_v24 = vld [vmem:[#allocation5 + $0x2cc] ss:$16 sps:$4 sm:$0xff]   ;;  %v2918_v26 = vld [vmem:[#allocation5 + $0x2c8] ss:$16 sps:$4 sm:$0xff]  }
  0x90   :  { %1544 = vmatprep.subr.bf16.mxu1 %v2842_v27  ;;  %v2923_v27 = vld [vmem:[#allocation5 + $0x12c] ss:$16 sps:$4 sm:$0xff]  }
  0x92   :  { %2599 = vmatmul.mubr.msk.bf16.vlgmr.msra.gmra.mxu1 %vm1376_vm0, %v3350_v29  ;;  %1471 = vmatpush1.bf16.msra.mxu0 %v2837_v28  ;;  %v2926_v28 = vld [vmem:[#allocation5 + $0x2ac] ss:$16 sps:$4 sm:$0xff]  }
  0x93   :  { %1545 = vmatpush1.bf16.msra.mxu1 %v2840_v30  ;;  %1472 = vmatprep.subr.bf16.mxu0 %v2845_v31  ;;  %v2921_v30 = vld [vmem:[#allocation5 + $0x128] ss:$16 sps:$4 sm:$0xff]  }
  0x94   :  { %1546 = vmatprep.subr.bf16.mxu1 %v2848_v32  ;;  %1576 = vmatprep.mubr.bf16.mxu1 %v3337_v49  ;;  %v2869_v49 = vld [vmem:[#allocation5 + $0x5c4] ss:$16 sps:$4 sm:$0xff]   ;;  %v2924_v31 = vld [vmem:[#allocation5 + $0x2a8] ss:$16 sps:$4 sm:$0xff]   ;;  %v2929_v32 = vld [vmem:[#allocation5 + $0x10c] ss:$16 sps:$4 sm:$0xff]  }
  0x96   :  { %1473 = vmatpush1.bf16.msra.mxu0 %v2843_v33  ;;  %v2932_v33 = vld [vmem:[#allocation5 + $0x28c] ss:$16 sps:$4 sm:$0xff]  }
  0x97   :  { %1547 = vmatpush1.bf16.msra.mxu1 %v2846_v34  ;;  %1474 = vmatprep.subr.bf16.mxu0 %v2851_v35  ;;  %v2927_v34 = vld [vmem:[#allocation5 + $0x108] ss:$16 sps:$4 sm:$0xff]  }
  0x98   :  { %1548 = vmatprep.subr.bf16.mxu1 %v2854_v36  ;;  %v2930_v35 = vld [vmem:[#allocation5 + $0x288] ss:$16 sps:$4 sm:$0xff]   ;;  %v2935_v36 = vld [vmem:[#allocation5 + $0x26c] ss:$16 sps:$4 sm:$0xff]  }
  0x9a   :  { %1475 = vmatpush1.bf16.msra.mxu0 %v2849_v37  ;;  %v2938_v37 = vld [vmem:[#allocation5 + $0x4ec] ss:$16 sps:$4 sm:$0xff]  }
  0x9b   :  { %1549 = vmatpush1.bf16.msra.mxu1 %v2852_v39  ;;  %1476 = vmatprep.subr.bf16.mxu0 %v2857_v40  ;;  %v2936_v39 = vld [vmem:[#allocation5 + $0x4e8] ss:$16 sps:$4 sm:$0xff]   ;;  %v2941_v40 = vld [vmem:[#allocation5 + $0x24c] ss:$16 sps:$4 sm:$0xff]  }
  0x9c   :  { %1550 = vmatprep.subr.bf16.mxu1 %v2860_v42  ;;  %v2939_v42 = vld [vmem:[#allocation5 + $0x248] ss:$16 sps:$4 sm:$0xff]  }
  0x9e   :  { %1477 = vmatpush1.bf16.msra.mxu0 %v2855_v43  ;;  %v2942_v43 = vld [vmem:[#allocation5 + $0x4c8] ss:$16 sps:$4 sm:$0xff]  }
  0x9f   :  { %1551 = vmatpush1.bf16.msra.mxu1 %v2858_v44  ;;  %1478 = vmatprep.subr.bf16.mxu0 %v2863_v45  ;;  %v2947_v44 = vld [vmem:[#allocation5 + $0x22c] ss:$16 sps:$4 sm:$0xff]  }
  0xa0   :  { %1552 = vmatprep.subr.bf16.mxu1 %v2866_v46  ;;  %v2950_v45 = vld [vmem:[#allocation5 + $0x4ac] ss:$16 sps:$4 sm:$0xff]   ;;  %v2945_v46 = vld [vmem:[#allocation5 + $0x228] ss:$16 sps:$4 sm:$0xff]  }
  0xa2   :  { %1479 = vmatpush2.bf16.msra.mxu0 %v2861_v47  ;;  %v2948_v47 = vld [vmem:[#allocation5 + $0x4a8] ss:$16 sps:$4 sm:$0xff]  }
  0xa3   :  { %1553 = vmatpush1.bf16.msra.mxu1 %v2864_v48  ;;  %1480 = vmatprep.subr.bf16.mxu0 %v2869_v49  ;;  %v2953_v48 = vld [vmem:[#allocation5 + $0x20c] ss:$16 sps:$4 sm:$0xff]  }
  0xa4   :  { %1554 = vmatprep.subr.bf16.mxu1 %v2872_v50  ;;  %v2956_v49 = vld [vmem:[#allocation5 + $0x48c] ss:$16 sps:$4 sm:$0xff]   ;;  %v2951_v50 = vld [vmem:[#allocation5 + $0x208] ss:$16 sps:$4 sm:$0xff]  }
  0xa6   :  { %1481 = vmatpush2.bf16.msra.mxu0 %v2867_v51  ;;  %v2959_v51 = vld [vmem:[#allocation5 + $0x3ec] ss:$16 sps:$4 sm:$0xff]  }
  0xa7   :  { %1555 = vmatpush1.bf16.msra.mxu1 %v2870_v53  ;;  %1482 = vmatprep.subr.bf16.mxu0 %v2875_v54  ;;  %v2962_v53 = vld [vmem:[#allocation5 + $0x46c] ss:$16 sps:$4 sm:$0xff]   ;;  %v2957_v54 = vld [vmem:[#allocation5 + $0x3e8] ss:$16 sps:$4 sm:$0xff]  }
  0xa8   :  { %1556 = vmatprep.subr.bf16.mxu1 %v2878_v55  ;;  %v2960_v55 = vld [vmem:[#allocation5 + $0x468] ss:$16 sps:$4 sm:$0xff]  }
  0xaa   :  { %1483 = vmatpush2.bf16.msra.mxu0 %v2873_v56  ;;  %v2965_v56 = vld [vmem:[#allocation5 + $0x3cc] ss:$16 sps:$4 sm:$0xff]  }
  0xab   :  { %1557 = vmatpush1.bf16.msra.mxu1 %v2876_v57  ;;  %1484 = vmatprep.subr.bf16.mxu0 %v2881_v58  ;;  %v2968_v57 = vld [vmem:[#allocation5 + $0x44c] ss:$16 sps:$4 sm:$0xff]   ;;  %v2966_v58 = vld [vmem:[#allocation5 + $0x448] ss:$16 sps:$4 sm:$0xff]  }
  0xac   :  { %1558 = vmatprep.subr.bf16.mxu1 %v2884_v59  ;;  %v2971_v59 = vld [vmem:[#allocation5 + $0x3ac] ss:$16 sps:$4 sm:$0xff]  }
  0xae   :  { %1485 = vmatpush2.bf16.msra.mxu0 %v2879_v60  ;;  %v2974_v60 = vld [vmem:[#allocation5 + $0x42c] ss:$16 sps:$4 sm:$0xff]  }
  0xaf   :  { %1559 = vmatpush1.bf16.msra.mxu1 %v2882_v61  ;;  %1486 = vmatprep.subr.bf16.mxu0 %v2887_v62  ;;  %v2969_v61 = vld [vmem:[#allocation5 + $0x3a8] ss:$16 sps:$4 sm:$0xff]  }
  0xb0   :  { %1560 = vmatprep.subr.bf16.mxu1 %v2890_v63  ;;  %v2972_v62 = vld [vmem:[#allocation5 + $0x428] ss:$16 sps:$4 sm:$0xff]   ;;  %v2977_v63 = vld [vmem:[#allocation5 + $0x38c] ss:$16 sps:$4 sm:$0xff]  }
  0xb2   :  { %1487 = vmatpush2.bf16.msra.mxu0 %v2885_v0  ;;  %v2980_v0 = vld [vmem:[#allocation5 + $0x40c] ss:$16 sps:$4 sm:$0xff]  }
  0xb3   :  { %1561 = vmatpush2.bf16.msra.mxu1 %v2888_v1  ;;  %1488 = vmatprep.subr.bf16.mxu0 %v2893_v2  ;;  %v2975_v1 = vld [vmem:[#allocation5 + $0x388] ss:$16 sps:$4 sm:$0xff]  }
  0xb4   :  { %1562 = vmatprep.subr.bf16.mxu1 %v2896_v3  ;;  %v2978_v2 = vld [vmem:[#allocation5 + $0x408] ss:$16 sps:$4 sm:$0xff]   ;;  %v2983_v3 = vld [vmem:[#allocation5 + $0x36c] ss:$16 sps:$4 sm:$0xff]  }
  0xb6   :  { %1489 = vmatpush2.bf16.msra.mxu0 %v2891_v4  ;;  %v2986_v4 = vld [vmem:[#allocation5 + $0x5ec] ss:$16 sps:$4 sm:$0xff]  }
  0xb7   :  { %1563 = vmatpush2.bf16.msra.mxu1 %v2894_v5  ;;  %1490 = vmatprep.subr.bf16.mxu0 %v2899_v6  ;;  %v2981_v5 = vld [vmem:[#allocation5 + $0x368] ss:$16 sps:$4 sm:$0xff]  }
  0xb8   :  { %1564 = vmatprep.subr.bf16.mxu1 %v2902_v7  ;;  %v2984_v6 = vld [vmem:[#allocation5 + $0x5e8] ss:$16 sps:$4 sm:$0xff]   ;;  %v2989_v7 = vld [vmem:[#allocation5 + $0x34c] ss:$16 sps:$4 sm:$0xff]  }
  0xba   :  { %1491 = vmatpush2.bf16.msra.mxu0 %v2897_v10  ;;  %v2992_v10 = vld [vmem:[#allocation5 + $0x5cc] ss:$16 sps:$4 sm:$0xff]  }
  0xbb   :  { %1565 = vmatpush2.bf16.msra.mxu1 %v2900_v11  ;;  %1492 = vmatprep.subr.bf16.mxu0 %v2905_v12  ;;  %v2987_v11 = vld [vmem:[#allocation5 + $0x348] ss:$16 sps:$4 sm:$0xff]  }
  0xbc   :  { %1566 = vmatprep.subr.bf16.mxu1 %v2908_v13  ;;  %v2990_v12 = vld [vmem:[#allocation5 + $0x5c8] ss:$16 sps:$4 sm:$0xff]   ;;  %v2995_v13 = vld [vmem:[#allocation5 + $0x32c] ss:$16 sps:$4 sm:$0xff]  }
  0xbe   :  { %1493 = vmatpush2.bf16.msra.mxu0 %v2903_v14  ;;  %v2998_v14 = vld [vmem:[#allocation5 + $0x5ac] ss:$16 sps:$4 sm:$0xff]  }
  0xbf   :  { %1567 = vmatpush2.bf16.msra.mxu1 %v2906_v15  ;;  %1585 = vmatprep.subr.bf16.mxu0 %v2914_v19  ;;  %v2993_v15 = vld [vmem:[#allocation5 + $0x328] ss:$16 sps:$4 sm:$0xff]   ;;  %v3004_v19 = vld [vmem:[#allocation5 + $0x58c] ss:$16 sps:$4 sm:$0xff]  }
  0xc0   :  { %1568 = vmatprep.subr.bf16.mxu1 %v2911_v17  ;;  %v3001_v17 = vld [vmem:[#allocation5 + $0x30c] ss:$16 sps:$4 sm:$0xff]  }
  0xc1   :  { %1495 = vmatmul.mubr.bf16.vlgmr.msra.gmra.mxu0 %v3358_v20 }
  0xc2   :  { %1586 = vmatpush1.bf16.msra.mxu0 %v2912_v22  ;;  %1617 = vmatprep.mubr.bf16.mxu0 %v3339_v52  ;;  %v2944_v52 = vld [vmem:[#allocation5 + $0x4cc] ss:$16 sps:$4 sm:$0xff]   ;;  %v3002_v22 = vld [vmem:[#allocation5 + $0x588] ss:$16 sps:$4 sm:$0xff]  }
  0xc3   :  { %1569 = vmatpush2.bf16.msra.mxu1 %v2909_v21  ;;  %1587 = vmatprep.subr.bf16.mxu0 %v2920_v24  ;;  %v2999_v21 = vld [vmem:[#allocation5 + $0x308] ss:$16 sps:$4 sm:$0xff]  }
  0xc4   :  { %1570 = vmatprep.subr.bf16.mxu1 %v2917_v23  ;;  %v3007_v23 = vld [vmem:[#allocation5 + $0x56c] ss:$16 sps:$4 sm:$0xff]   ;;  %v3031_v24 = vld [vmem:[#allocation8 + $0x74] ss:$8 sps:$4 sm:$0xff]  }
  0xc6   :  { %1588 = vmatpush1.bf16.msra.mxu0 %v2918_v26  ;;  %v3029_v26 = vld [vmem:[#allocation8 + $0x70] ss:$8 sps:$4 sm:$0xff]  }
  0xc7   :  { %1571 = vmatpush2.bf16.msra.mxu1 %v2915_v25  ;;  %1589 = vmatprep.subr.bf16.mxu0 %v2926_v28  ;;  %v3005_v25 = vld [vmem:[#allocation5 + $0x568] ss:$16 sps:$4 sm:$0xff]  }
  0xc8   :  { %1572 = vmatprep.subr.bf16.mxu1 %v2923_v27  ;;  %v3010_v27 = vld [vmem:[#allocation5 + $0x54c] ss:$16 sps:$4 sm:$0xff]   ;;  %v3034_v28 = vld [vmem:[#allocation8 + $0x64] ss:$8 sps:$4 sm:$0xff]  }
  0xca   :  { %1590 = vmatpush1.bf16.msra.mxu0 %v2924_v31  ;;  %v3032_v31 = vld [vmem:[#allocation8 + $0x60] ss:$8 sps:$4 sm:$0xff]  }
  0xcb   :  { %1573 = vmatpush2.bf16.msra.mxu1 %v2921_v30  ;;  %1591 = vmatprep.subr.bf16.mxu0 %v2932_v33  ;;  %v3008_v30 = vld [vmem:[#allocation5 + $0x548] ss:$16 sps:$4 sm:$0xff]  }
  0xcc   :  { %1574 = vmatprep.subr.bf16.mxu1 %v2929_v32  ;;  %v3013_v32 = vld [vmem:[#allocation5 + $0x52c] ss:$16 sps:$4 sm:$0xff]   ;;  %v3037_v33 = vld [vmem:[#allocation8 + $0x54] ss:$8 sps:$4 sm:$0xff]  }
  0xce   :  { %1592 = vmatpush1.bf16.msra.mxu0 %v2930_v35  ;;  %v3035_v35 = vld [vmem:[#allocation8 + $0x50] ss:$8 sps:$4 sm:$0xff]  }
  0xcf   :  { %1575 = vmatpush2.bf16.msra.mxu1 %v2927_v34  ;;  %1593 = vmatprep.subr.bf16.mxu0 %v2935_v36  ;;  %v3011_v34 = vld [vmem:[#allocation5 + $0x528] ss:$16 sps:$4 sm:$0xff]   ;;  %v3016_v36 = vld [vmem:[#allocation5 + $0x50c] ss:$16 sps:$4 sm:$0xff]  }
  0xd0   :  { %1626 = vmatprep.subr.bf16.mxu1 %v2938_v37  ;;  %v3040_v37 = vld [vmem:[#allocation8 + $0x44] ss:$8 sps:$4 sm:$0xff]  }
  0xd2   :  { %1577 = vmatmul.mubr.bf16.vlgmr.msra.gmra.mxu1 %v3343_v8  ;;  %1594 = vmatpush1.bf16.msra.mxu0 %v2933_v38  ;;  %v2954_v8 = vld [vmem:[#allocation5 + $0x488] ss:$16 sps:$4 sm:$0xff]  }
  0xd3   :  { %1627 = vmatpush1.bf16.msra.mxu1 %v2936_v39  ;;  %1595 = vmatprep.subr.bf16.mxu0 %v2941_v40  ;;  %v3014_v38 = vld [vmem:[#allocation5 + $0x508] ss:$16 sps:$4 sm:$0xff]   ;;  %v3019_v39 = vld [vmem:[#allocation5 + $0x66c] ss:$16 sps:$4 sm:$0xff]  }
  0xd4   :  { %1628 = vmatprep.subr.bf16.mxu1 %v2944_v52  ;;  %1658 = vmatprep.mubr.bf16.mxu1 %v3355_v41  ;;  %v2963_v41 = vld [vmem:[#allocation5 + $0x3c8] ss:$16 sps:$4 sm:$0xff]  }
  0xd5   :  { %v3043_v40 = vld [vmem:[#allocation8 + $0x34] ss:$8 sps:$4 sm:$0xff]  }
  0xd6   :  { %1596 = vmatpush1.bf16.msra.mxu0 %v2939_v42  ;;  %v3017_v52 = vld [vmem:[#allocation5 + $0x668] ss:$16 sps:$4 sm:$0xff]   ;;  %v3022_v42 = vld [vmem:[#allocation5 + $0x64c] ss:$16 sps:$4 sm:$0xff]  }
  0xd7   :  { %1629 = vmatpush1.bf16.msra.mxu1 %v2942_v43  ;;  %1597 = vmatprep.subr.bf16.mxu0 %v2947_v44  ;;  %v3041_v43 = vld [vmem:[#allocation8 + $0x30] ss:$8 sps:$4 sm:$0xff]   ;;  %v3046_v44 = vld [vmem:[#allocation8 + $0x24] ss:$8 sps:$4 sm:$0xff]  }
  0xd8   :  { %1630 = vmatprep.subr.bf16.mxu1 %v2950_v45  ;;  %v3020_v45 = vld [vmem:[#allocation5 + $0x648] ss:$16 sps:$4 sm:$0xff]  }
  0xda   :  { %1598 = vmatpush1.bf16.msra.mxu0 %v2945_v46  ;;  %v3025_v46 = vld [vmem:[#allocation5 + $0x62c] ss:$16 sps:$4 sm:$0xff]  }
  0xdb   :  { %1631 = vmatpush1.bf16.msra.mxu1 %v2948_v47  ;;  %1599 = vmatprep.subr.bf16.mxu0 %v2953_v48  ;;  %v3044_v47 = vld [vmem:[#allocation8 + $0x20] ss:$8 sps:$4 sm:$0xff]   ;;  %v3049_v48 = vld [vmem:[#allocation8 + $0x14] ss:$8 sps:$4 sm:$0xff]  }
  0xdc   :  { %1632 = vmatprep.subr.bf16.mxu1 %v2956_v49  ;;  %v3023_v49 = vld [vmem:[#allocation5 + $0x628] ss:$16 sps:$4 sm:$0xff]  }
  0xde   :  { %1600 = vmatpush1.bf16.msra.mxu0 %v2951_v50  ;;  %v3028_v50 = vld [vmem:[#allocation5 + $0x60c] ss:$16 sps:$4 sm:$0xff]  }
  0xdf   :  { %1633 = vmatpush1.bf16.msra.mxu1 %v2954_v8  ;;  %1601 = vmatprep.subr.bf16.mxu0 %v2959_v51  ;;  %v3047_v8 = vld [vmem:[#allocation8 + $0x10] ss:$8 sps:$4 sm:$0xff]   ;;  %v3052_v51 = vld [vmem:[#allocation8 + $0x4] ss:$8 sps:$4 sm:$0xff]  }
  0xe0   :  { %1634 = vmatprep.subr.bf16.mxu1 %v2962_v53  ;;  %v3050_v53 = vld [vmem:[#allocation8] ss:$8 sps:$4 sm:$0xff]  }
  0xe2   :  { %1602 = vmatpush2.bf16.msra.mxu0 %v2957_v54  ;;  %v3055_v54 = vld [vmem:[#allocation8 + $0xf4] ss:$8 sps:$4 sm:$0xff]  }
  0xe3   :  { %1635 = vmatpush1.bf16.msra.mxu1 %v2960_v55  ;;  %1603 = vmatprep.subr.bf16.mxu0 %v2965_v56  ;;  %v3077_v55 = vld [vmem:[#allocation8 + $0x170] ss:$8 sps:$4 sm:$0xff]  }
  0xe4   :  { %1636 = vmatprep.subr.bf16.mxu1 %v2968_v57  ;;  %v3053_v56 = vld [vmem:[#allocation8 + $0xf0] ss:$8 sps:$4 sm:$0xff]   ;;  %v3082_v57 = vld [vmem:[#allocation8 + $0x164] ss:$8 sps:$4 sm:$0xff]  }
  0xe6   :  { %1604 = vmatpush2.bf16.msra.mxu0 %v2963_v41  ;;  %v3058_v41 = vld [vmem:[#allocation8 + $0xe4] ss:$8 sps:$4 sm:$0xff]  }
  0xe7   :  { %1637 = vmatpush1.bf16.msra.mxu1 %v2966_v58  ;;  %1605 = vmatprep.subr.bf16.mxu0 %v2971_v59  ;;  %v3080_v58 = vld [vmem:[#allocation8 + $0x160] ss:$8 sps:$4 sm:$0xff]  }
  0xe8   :  { %1638 = vmatprep.subr.bf16.mxu1 %v2974_v60  ;;  %v3056_v59 = vld [vmem:[#allocation8 + $0xe0] ss:$8 sps:$4 sm:$0xff]   ;;  %v3085_v60 = vld [vmem:[#allocation8 + $0x154] ss:$8 sps:$4 sm:$0xff]  }
  0xea   :  { %1606 = vmatpush2.bf16.msra.mxu0 %v2969_v61  ;;  %v3061_v61 = vld [vmem:[#allocation8 + $0xd4] ss:$8 sps:$4 sm:$0xff]  }
  0xeb   :  { %1639 = vmatpush1.bf16.msra.mxu1 %v2972_v62  ;;  %1607 = vmatprep.subr.bf16.mxu0 %v2977_v63  ;;  %v3083_v62 = vld [vmem:[#allocation8 + $0x150] ss:$8 sps:$4 sm:$0xff]  }
  0xec   :  { %1640 = vmatprep.subr.bf16.mxu1 %v2980_v0  ;;  %v3059_v63 = vld [vmem:[#allocation8 + $0xd0] ss:$8 sps:$4 sm:$0xff]   ;;  %v3088_v0 = vld [vmem:[#allocation8 + $0x144] ss:$8 sps:$4 sm:$0xff]  }
  0xee   :  { %1608 = vmatpush2.bf16.msra.mxu0 %v2975_v1  ;;  %v3064_v1 = vld [vmem:[#allocation8 + $0xc4] ss:$8 sps:$4 sm:$0xff]  }
  0xef   :  { %1641 = vmatpush1.bf16.msra.mxu1 %v2978_v2  ;;  %1609 = vmatprep.subr.bf16.mxu0 %v2983_v3  ;;  %v3086_v2 = vld [vmem:[#allocation8 + $0x140] ss:$8 sps:$4 sm:$0xff]   ;;  %v3091_v3 = vld [vmem:[#allocation8 + $0x134] ss:$8 sps:$4 sm:$0xff]  }
  0xf0   :  { %1642 = vmatprep.subr.bf16.mxu1 %v2986_v4  ;;  %v3067_v4 = vld [vmem:[#allocation8 + $0xb4] ss:$8 sps:$4 sm:$0xff]  }
  0xf2   :  { %1610 = vmatpush2.bf16.msra.mxu0 %v2981_v5  ;;  %v3089_v5 = vld [vmem:[#allocation8 + $0x130] ss:$8 sps:$4 sm:$0xff]  }
  0xf3   :  { %1643 = vmatpush2.bf16.msra.mxu1 %v2984_v6  ;;  %1611 = vmatprep.subr.bf16.mxu0 %v2989_v7  ;;  %v3065_v6 = vld [vmem:[#allocation8 + $0xb0] ss:$8 sps:$4 sm:$0xff]   ;;  %v3094_v7 = vld [vmem:[#allocation8 + $0x124] ss:$8 sps:$4 sm:$0xff]  }
  0xf4   :  { %1644 = vmatprep.subr.bf16.mxu1 %v2992_v10  ;;  %v3070_v10 = vld [vmem:[#allocation8 + $0xa4] ss:$8 sps:$4 sm:$0xff]  }
  0xf6   :  { %1612 = vmatpush2.bf16.msra.mxu0 %v2987_v11  ;;  %v3092_v11 = vld [vmem:[#allocation8 + $0x120] ss:$8 sps:$4 sm:$0xff]  }
  0xf7   :  { %1645 = vmatpush2.bf16.msra.mxu1 %v2990_v12  ;;  %1613 = vmatprep.subr.bf16.mxu0 %v2995_v13  ;;  %v3068_v12 = vld [vmem:[#allocation8 + $0xa0] ss:$8 sps:$4 sm:$0xff]   ;;  %v3073_v13 = vld [vmem:[#allocation8 + $0x94] ss:$8 sps:$4 sm:$0xff]  }
  0xf8   :  { %1646 = vmatprep.subr.bf16.mxu1 %v2998_v14  ;;  %v3071_v14 = vld [vmem:[#allocation8 + $0x90] ss:$8 sps:$4 sm:$0xff]  }
  0xfa   :  { %1614 = vmatpush2.bf16.msra.mxu0 %v2993_v15  ;;  %v3076_v15 = vld [vmem:[#allocation8 + $0x84] ss:$8 sps:$4 sm:$0xff]  }
  0xfb   :  { %1647 = vmatpush2.bf16.msra.mxu1 %v2996_v16  ;;  %1615 = vmatprep.subr.bf16.mxu0 %v3001_v17  ;;  %v3074_v16 = vld [vmem:[#allocation8 + $0x80] ss:$8 sps:$4 sm:$0xff]  }
  0xfc   :  { %1648 = vmatprep.subr.bf16.mxu1 %v3004_v19 }
  0xfe   :  { %1616 = vmatpush2.bf16.msra.mxu0 %v2999_v21  ;;  %v3097_v21 = vld [vmem:[#allocation8 + $0x114] ss:$8 sps:$4 sm:$0xff]  }
  0xff   :  { %1649 = vmatpush2.bf16.msra.mxu1 %v3002_v22  ;;  %2112 = vmatprep.subr.bf16.mxu0 %v3031_v24  ;;  %v3095_v22 = vld [vmem:[#allocation8 + $0x110] ss:$8 sps:$4 sm:$0xff]  }
 0x100   :  { %1650 = vmatprep.subr.bf16.mxu1 %v3007_v23 }
 0x101   :  { %1618 = vmatmul.mubr.bf16.vlgmr.msra.gmra.mxu0 %v3345_v9  ;;  %v3038_v9 = vld [vmem:[#allocation8 + $0x40] ss:$8 sps:$4 sm:$0xff]  }
 0x102   :  { %2113 = vmatpush1.bf16.msra.mxu0 %v3029_v26  ;;  %v3100_v26 = vld [vmem:[#allocation8 + $0x104] ss:$8 sps:$4 sm:$0xff]  }
 0x103   :  { %1651 = vmatpush2.bf16.msra.mxu1 %v3005_v25  ;;  %2114 = vmatprep.subr.bf16.mxu0 %v3034_v28  ;;  %v3098_v25 = vld [vmem:[#allocation8 + $0x100] ss:$8 sps:$4 sm:$0xff]  }
 0x104   :  { %1652 = vmatprep.subr.bf16.mxu1 %v3010_v27 }
 0x106   :  { %2115 = vmatpush1.bf16.msra.mxu0 %v3032_v31 }
 0x107   :  { %1653 = vmatpush2.bf16.msra.mxu1 %v3008_v30  ;;  %2116 = vmatprep.subr.bf16.mxu0 %v3037_v33  ;;  %v3103_v30 = vld [vmem:[#allocation8 + $0x1f4] ss:$8 sps:$4 sm:$0xff]   ;;  %v3101_v33 = vld [vmem:[#allocation8 + $0x1f0] ss:$8 sps:$4 sm:$0xff]  }
 0x108   :  { %1654 = vmatprep.subr.bf16.mxu1 %v3013_v32 }
 0x10a   :  { %2117 = vmatpush1.bf16.msra.mxu0 %v3035_v35  ;;  %v3104_v35 = vld [vmem:[#allocation8 + $0x1e0] ss:$8 sps:$4 sm:$0xff]  }
 0x10b   :  { %1655 = vmatpush2.bf16.msra.mxu1 %v3011_v34  ;;  %2118 = vmatprep.subr.bf16.mxu0 %v3040_v37  ;;  %v3106_v34 = vld [vmem:[#allocation8 + $0x1e4] ss:$8 sps:$4 sm:$0xff]   ;;  %v3109_v37 = vld [vmem:[#allocation8 + $0x1d4] ss:$8 sps:$4 sm:$0xff]  }
 0x10c   :  { %1656 = vmatprep.subr.bf16.mxu1 %v3016_v36 }
 0x10e   :  { %2119 = vmatpush1.bf16.msra.mxu0 %v3038_v9 }
 0x10f   :  { %1657 = vmatpush2.bf16.msra.mxu1 %v3014_v38  ;;  %2120 = vmatprep.subr.bf16.mxu0 %v3043_v40  ;;  %v3107_v38 = vld [vmem:[#allocation8 + $0x1d0] ss:$8 sps:$4 sm:$0xff]   ;;  %v3112_v40 = vld [vmem:[#allocation8 + $0x1c4] ss:$8 sps:$4 sm:$0xff]  }
 0x110   :  { %1675 = vmatprep.subr.bf16.mxu1 %v3019_v39 }
 0x112   :  { %1659 = vmatmul.mubr.bf16.vlgmr.msra.gmra.mxu1 %v3358_v20  ;;  %2121 = vmatpush1.bf16.msra.mxu0 %v3041_v43  ;;  %v3026_v20 = vld [vmem:[#allocation5 + $0x608] ss:$16 sps:$4 sm:$0xff]  }
 0x113   :  { %1676 = vmatpush1.bf16.msra.mxu1 %v3017_v52  ;;  %1699 = vmatprep.mubr.bf16.mxu1 %v3280_v18  ;;  %v3079_v18 = vld [vmem:[#allocation8 + $0x174] ss:$8 sps:$4 sm:$0xff]   ;;  %v3110_v52 = vld [vmem:[#allocation8 + $0x1c0] ss:$8 sps:$4 sm:$0xff]  }
 0x114   :  { %1677 = vmatprep.subr.bf16.mxu1 %v3022_v42  ;;  %2122 = vmatprep.subr.bf16.mxu0 %v3046_v44  ;;  %v3115_v43 = vld [vmem:[#allocation8 + $0x1b4] ss:$8 sps:$4 sm:$0xff]   ;;  %v3113_v44 = vld [vmem:[#allocation8 + $0x1b0] ss:$8 sps:$4 sm:$0xff]  }
 0x116   :  { %2123 = vmatpush1.bf16.msra.mxu0 %v3044_v47  ;;  %v3121_v47 = vld [vmem:[#allocation8 + $0x194] ss:$8 sps:$4 sm:$0xff]  }
 0x117   :  { %1678 = vmatpush1.bf16.msra.mxu1 %v3020_v45  ;;  %2124 = vmatprep.subr.bf16.mxu0 %v3049_v48  ;;  %v3118_v45 = vld [vmem:[#allocation8 + $0x1a4] ss:$8 sps:$4 sm:$0xff]   ;;  %v3119_v48 = vld [vmem:[#allocation8 + $0x190] ss:$8 sps:$4 sm:$0xff]  }
 0x118   :  { %1679 = vmatprep.subr.bf16.mxu1 %v3025_v46  ;;  %v3116_v46 = vld [vmem:[#allocation8 + $0x1a0] ss:$8 sps:$4 sm:$0xff]  }
 0x11a   :  { %2125 = vmatpush1.bf16.msra.mxu0 %v3047_v8  ;;  %v316_v8 = vlaneseq }
 0x11b   :  { %1680 = vmatpush1.bf16.msra.mxu1 %v3023_v49  ;;  %2126 = vmatprep.subr.bf16.mxu0 %v3052_v51  ;;  %v3124_v49 = vld [vmem:[#allocation8 + $0x184] ss:$8 sps:$4 sm:$0xff]  }
 0x11c   :  { %1681 = vmatprep.subr.bf16.mxu1 %v3028_v50  ;;  %v3122_v50 = vld [vmem:[#allocation8 + $0x180] ss:$8 sps:$4 sm:$0xff]   ;;  %v3369_v51 = vshrl.u32 %v316_v8, 7 }
 0x11e   :  { %2127 = vmatpush1.bf16.msra.mxu0 %v3050_v53  ;;  %v314_v53 = vld [vmem:[#allocation7] sm:$0xf] }
 0x11f   :  { %1682 = vmatpush1.bf16.msra.mxu1 %v3026_v20  ;;  %2128 = vmatprep.subr.bf16.mxu0 %v3055_v54  ;;  %v318_v20 = vsub.s32 0, %v3369_v51 }
 0x120   :  { %2153 = vmatprep.subr.bf16.mxu1 %v3079_v18  ;;  %v322_v18 = vsub.s32 1, %v3369_v51 }
 0x121   :  { %v319_v54 = vrot.slane %v314_v53, %v318_v20 }
 0x122   :  { %2600 = vmatmul.mubr.msk.bf16.vlgmr.msra.gmra.mxu1 %vm1376_vm0, %v3350_v29  ;;  %2129 = vmatpush2.bf16.msra.mxu0 %v3053_v56  ;;  %v3062_v29 = vld [vmem:[#allocation8 + $0xc0] ss:$8 sps:$4 sm:$0xff]  }
 0x123   :  { %2154 = vmatpush1.bf16.msra.mxu1 %v3077_v55  ;;  %2130 = vmatprep.subr.bf16.mxu0 %v3058_v41  ;;  %v323_v55 = vrot.slane %v314_v53, %v322_v18 }
 0x124   :  { %2155 = vmatprep.subr.bf16.mxu1 %v3082_v57 }
 0x126   :  { %2131 = vmatpush2.bf16.msra.mxu0 %v3056_v59 }
 0x127   :  { %2156 = vmatpush1.bf16.msra.mxu1 %v3080_v58  ;;  %2132 = vmatprep.subr.bf16.mxu0 %v3061_v61 }
 0x128   :  { %2157 = vmatprep.subr.bf16.mxu1 %v3085_v60 }
 0x12a   :  { %2133 = vmatpush2.bf16.msra.mxu0 %v3059_v63 }
 0x12b   :  { %2158 = vmatpush1.bf16.msra.mxu1 %v3083_v62  ;;  %2134 = vmatprep.subr.bf16.mxu0 %v3064_v1 }
 0x12c   :  { %2159 = vmatprep.subr.bf16.mxu1 %v3088_v0 }
 0x12e   :  { %2135 = vmatpush2.bf16.msra.mxu0 %v3062_v29 }
 0x12f   :  { %2160 = vmatpush1.bf16.msra.mxu1 %v3086_v2  ;;  %2136 = vmatprep.subr.bf16.mxu0 %v3067_v4 }
 0x130   :  { %2161 = vmatprep.subr.bf16.mxu1 %v3091_v3 }
 0x132   :  { %2137 = vmatpush2.bf16.msra.mxu0 %v3065_v6 }
 0x133   :  { %2162 = vmatpush1.bf16.msra.mxu1 %v3089_v5  ;;  %2138 = vmatprep.subr.bf16.mxu0 %v3070_v10 }
 0x134   :  { %2163 = vmatprep.subr.bf16.mxu1 %v3094_v7 }
 0x136   :  { %2139 = vmatpush2.bf16.msra.mxu0 %v3068_v12 }
 0x137   :  { %2164 = vmatpush1.bf16.msra.mxu1 %v3092_v11  ;;  %2140 = vmatprep.subr.bf16.mxu0 %v3073_v13 }
 0x138   :  { %2165 = vmatprep.subr.bf16.mxu1 %v3097_v21  ;;  %v3126_v21 = vld [vmem:[#allocation10 + $0x38] sm:$0xff]  }
 0x13a   :  { %2141 = vmatpush2.bf16.msra.mxu0 %v3071_v14 }
 0x13b   :  { %2142 = vmatprep.subr.bf16.mxu0 %v3076_v15  ;;  %2166 = vmatpush1.bf16.msra.mxu1 %v3095_v22  ;;  %v3127_v22 = vld [vmem:[#allocation10 + $0x70] sm:$0xff]  }
 0x13c   :  { %2167 = vmatprep.subr.bf16.mxu1 %v3100_v26  ;;  %v3128_v26 = vld [vmem:[#allocation10 + $0x30] sm:$0xff]  }
 0x13e   :  { %2143 = vmatpush2.bf16.msra.mxu0 %v3074_v16 }
 0x13f   :  { %2168 = vmatpush1.bf16.msra.mxu1 %v3098_v25  ;;  %v330_v25 = vsub.s32 3, %v3369_v51 }
 0x140   :  { %2169 = vmatprep.subr.bf16.mxu1 %v3103_v30 }
 0x141   :  { %v1414_v17 = vpop.f32.mrf.mxu0 }
 0x142   :  { %v1455_v19 = vpop.f32.mrf.mxu1  ;;  %v1415_v56 = vadd.f32 %v1414_v17, %v319_v54 }
 0x143   :  { %v1416_v23 = vpop.f32.mrf.mxu0  ;;  %2170 = vmatpush2.bf16.msra.mxu1 %v3101_v33  ;;  %v3131_v33 = vld [vmem:[#allocation10 + $0x60] sm:$0xff]  }
 0x144   :  { %v1457_v24 = vpop.f32.mrf.mxu1  ;;  %2171 = vmatprep.subr.bf16.mxu1 %v3106_v34  ;;  %v1417_v57 = vadd.f32 %v1416_v23, %v323_v55  ;;  %v1456_v41 = vadd.f32 %v1455_v19, %v1415_v56  ;;  %v3125_v19 = vld [vmem:[#allocation10 + $0x78] sm:$0xff]   ;;  %v326_v23 = vsub.s32 2, %v3369_v51  ;;  %v3137_v55 = vld [vmem:[#allocation10 + $0x48] sm:$0xff]   ;;  %v2665_v51 = vld [vmem:[%s3398_s6] ss:$0 sm:$0xff] }
 0x145   :  { %v1418_v28 = vpop.f32.mrf.mxu0  ;;  %2682 = vmatprep.subr.bf16.mxu0 %v3125_v19  ;;  %v3138_v56 = vld [vmem:[#allocation10 + $0x8] sm:$0xff]  }
 0x146   :  { %v1459_v27 = vpop.f32.mrf.mxu1  ;;  %v1458_v59 = vadd.f32 %v1457_v24, %v1417_v57  ;;  %v3129_v28 = vld [vmem:[#allocation10 + $0x68] sm:$0xff]   ;;  %v327_v30 = vrot.slane %v314_v53, %v326_v23  ;;  %v3139_v57 = vld [vmem:[#allocation10 + $0x40] sm:$0xff]  }
 0x147   :  { %v1419_v32 = vpop.f32.mrf.mxu0  ;;  %2172 = vmatpush2.bf16.msra.mxu1 %v3104_v35 }
 0x148   :  { %v1460_v31 = vpop.f32.mrf.mxu1  ;;  %2173 = vmatprep.subr.bf16.mxu1 %v3109_v37  ;;  %v3130_v32 = vld [vmem:[#allocation10 + $0x28] sm:$0xff]   ;;  %v3132_v37 = vld [vmem:[#allocation10 + $0x20] sm:$0xff]  }
 0x149   :  { %v331_v31 = vrot.slane %v314_v53, %v330_v25 }
 0x14b   :  { %2174 = vmatpush2.bf16.msra.mxu1 %v3107_v38  ;;  %v3133_v38 = vld [vmem:[#allocation10 + $0x58] sm:$0xff]  }
 0x14c   :  { %2175 = vmatprep.subr.bf16.mxu1 %v3112_v40 }
 0x14f   :  { %2176 = vmatpush2.bf16.msra.mxu1 %v3110_v52 }
 0x150   :  { %2177 = vmatprep.subr.bf16.mxu1 %v3115_v43  ;;  %v3134_v43 = vld [vmem:[#allocation10 + $0x18] sm:$0xff]  }
 0x152   :  { %v1537_v36 = vpop.f32.mrf.mxu1 }
 0x153   :  { %2178 = vmatpush2.bf16.msra.mxu1 %v3113_v44 }
 0x154   :  { %v1539_v9 = vpop.f32.mrf.mxu1  ;;  %2179 = vmatprep.subr.bf16.mxu1 %v3118_v45  ;;  %v3135_v45 = vld [vmem:[#allocation10 + $0x50] sm:$0xff]  }
 0x156   :  { %v1541_v39 = vpop.f32.mrf.mxu1 }
 0x157   :  { %2180 = vmatpush2.bf16.msra.mxu1 %v3116_v46 }
 0x158   :  { %v1542_v42 = vpop.f32.mrf.mxu1  ;;  %2181 = vmatprep.subr.bf16.mxu1 %v3121_v47 }
 0x15b   :  { %2182 = vmatpush2.bf16.msra.mxu1 %v3119_v48 }
 0x15c   :  { %2183 = vmatprep.subr.bf16.mxu1 %v3124_v49 }
 0x15f   :  { %2184 = vmatpush2.bf16.msra.mxu1 %v3122_v50  ;;  %v3136_v50 = vld [vmem:[#allocation10 + $0x10] sm:$0xff]  }
 0x181   :  { %v1496_v58 = vpop.f32.mrf.mxu0 }
 0x182   :  { %v1497_v60 = vadd.f32 %v1496_v58, %v1456_v41  ;;  %v3140_v41 = vld [vmem:[#allocation10] sm:$0xff]  }
 0x183   :  { %v1498_v61 = vpop.f32.mrf.mxu0 }
 0x184   :  { %v1538_v62 = vadd.f32 %v1537_v36, %v1497_v60  ;;  %v1499_v63 = vadd.f32 %v1498_v61, %v1458_v59 }
 0x185   :  { %v1500_v0 = vpop.f32.mrf.mxu0 }
 0x186   :  { %v1540_v1 = vadd.f32 %v1539_v9, %v1499_v63  ;;  %v1708_v2 = vmax.f32 %v1538_v62, 0.0  ;;  %v1780_v62 = vld [vmem:[%s3396_s4] sm:$0x3] }
 0x187   :  { %v1501_v29 = vpop.f32.mrf.mxu0  ;;  %v1785_v63 = vrot.slane %v1780_v62, %v318_v20  ;;  %v1789_v0 = vrot.slane %v1780_v62, %v322_v18 }
 0x188   :  { %v1709_v3 = vmax.f32 %v1540_v1, 0.0  ;;  %v1712_v5 = vpack.c.bf16 %v1708_v2, %v1708_v2 }
 0x18a   :  { %v1713_v4 = vpack.c.bf16 %v1709_v3, %v1709_v3 }
 0x18c   :  { %2144 = vmatprep.mubr.bf16.mxu0 %v1713_v4 }
 0x18d   :  { %2145 = vmatmul.mubr.bf16.vlgmr.msra.gmra.mxu0 %v1712_v5 }
 0x18e   :  { %2683 = vmatpush3.bf16.msra.mxu0 %v3126_v21 }
 0x18f   :  { %2684 = vmatprep.subr.bf16.mxu0 %v3127_v22 }
 0x192   :  { %v1578_v6 = vpop.f32.mrf.mxu1  ;;  %2685 = vmatpush3.bf16.msra.mxu0 %v3128_v26 }
 0x193   :  { %2686 = vmatprep.subr.bf16.mxu0 %v3129_v28  ;;  %v1579_v34 = vadd.f32 %v1578_v6, %v327_v30 }
 0x194   :  { %v1580_v7 = vpop.f32.mrf.mxu1 }
 0x195   :  { %v1581_v35 = vadd.f32 %v1580_v7, %v331_v31 }
 0x196   :  { %v1582_v10 = vpop.f32.mrf.mxu1  ;;  %2687 = vmatpush3.bf16.msra.mxu0 %v3130_v32 }
 0x197   :  { %2688 = vmatprep.subr.bf16.mxu0 %v3131_v33 }
 0x198   :  { %v1583_v11 = vpop.f32.mrf.mxu1 }
 0x19a   :  { %2689 = vmatpush3.bf16.msra.mxu0 %v3132_v37 }
 0x19b   :  { %2690 = vmatprep.subr.bf16.mxu0 %v3133_v38 }
 0x19e   :  { %2691 = vmatpush3.bf16.msra.mxu0 %v3134_v43 }
 0x19f   :  { %2692 = vmatprep.subr.bf16.mxu0 %v3135_v45 }
 0x1a2   :  { %2693 = vmatpush3.bf16.msra.mxu0 %v3136_v50 }
 0x1a3   :  { %2694 = vmatprep.subr.bf16.mxu0 %v3137_v55 }
 0x1a6   :  { %2695 = vmatpush3.bf16.msra.mxu0 %v3138_v56 }
 0x1a7   :  { %2696 = vmatprep.subr.bf16.mxu0 %v3139_v57 }
 0x1aa   :  { %2697 = vmatpush3.bf16.msra.mxu0 %v3140_v41 }
 0x1c1   :  { %v1619_v12 = vpop.f32.mrf.mxu0 }
 0x1c2   :  { %v1620_v36 = vadd.f32 %v1619_v12, %v1579_v34 }
 0x1c3   :  { %v1621_v13 = vpop.f32.mrf.mxu0 }
 0x1c4   :  { %v1622_v9 = vadd.f32 %v1621_v13, %v1581_v35 }
 0x1c5   :  { %v1623_v14 = vpop.f32.mrf.mxu0 }
 0x1c7   :  { %v1624_v15 = vpop.f32.mrf.mxu0 }
 0x1d2   :  { %v1660_v16 = vpop.f32.mrf.mxu1 }
 0x1d3   :  { %v1661_v39 = vadd.f32 %v1660_v16, %v1620_v36 }
 0x1d4   :  { %v1662_v17 = vpop.f32.mrf.mxu1 }
 0x1d5   :  { %v1663_v52 = vadd.f32 %v1662_v17, %v1622_v9 }
 0x1d6   :  { %v1664_v24 = vpop.f32.mrf.mxu1 }
 0x1d8   :  { %v1665_v27 = vpop.f32.mrf.mxu1 }
 0x1e2   :  { %v1701_v40 = vpop.f32.mrf.mxu1 }
 0x1e3   :  { %v1702_v42 = vadd.f32 %v1701_v40, %v1661_v39 }
 0x1e4   :  { %v1703_v44 = vpop.f32.mrf.mxu1 }
 0x1e5   :  { %v1704_v46 = vadd.f32 %v1703_v44, %v1663_v52  ;;  %v1710_v47 = vmax.f32 %v1702_v42, 0.0 }
 0x1e6   :  { %v1705_v48 = vpop.f32.mrf.mxu1 }
 0x1e7   :  { %v1711_v49 = vmax.f32 %v1704_v46, 0.0  ;;  %v1714_v54 = vpack.c.bf16 %v1710_v47, %v1710_v47 }
 0x1e8   :  { %v1706_v8 = vpop.f32.mrf.mxu1 }
 0x1e9   :  { %v1715_v53 = vpack.c.bf16 %v1711_v49, %v1711_v49 }
 0x1eb   :  { %2185 = vmatprep.mubr.bf16.mxu1 %v1715_v53 }
 0x1ec   :  { %2186 = vmatmul.mubr.bf16.vlgmr.msra.gmra.mxu1 %v1714_v54 }
 0x24d   :  { %v2146_v58 = vpop.f32.mrf.mxu0 }
 0x24e   :  { %v2147_v1 = vadd.f32 %v2146_v58, %v1785_v63 }
 0x24f   :  { %v2148_v59 = vpop.f32.mrf.mxu0 }
 0x250   :  { %v2149_v29 = vadd.f32 %v2148_v59, %v1789_v0 }
 0x251   :  { %v2150_v60 = vpop.f32.mrf.mxu0 }
 0x253   :  { %v2151_v61 = vpop.f32.mrf.mxu0 }
 0x2ac   :  { %v2187_v2 = vpop.f32.mrf.mxu1 }
 0x2ad   :  { %v2188_v3 = vadd.f32 %v2187_v2, %v2147_v1 }
 0x2ae   :  { %v2189_v4 = vpop.f32.mrf.mxu1 }
 0x2af   :  { %v2190_v5 = vadd.f32 %v2189_v4, %v2149_v29  ;;  %v2194_v6 = vmax.f32 %v2188_v3, 0.0 }
 0x2b0   :  { %v2191_v7 = vpop.f32.mrf.mxu1 }
 0x2b1   :  { %v2195_v10 = vmax.f32 %v2190_v5, 0.0  ;;  %v2196_v13 = vpack.c.bf16 %v2194_v6, %v2194_v6 }
 0x2b2   :  { %v2192_v11 = vpop.f32.mrf.mxu1 }
 0x2b3   :  { %v2197_v12 = vpack.c.bf16 %v2195_v10, %v2195_v10 }
 0x2b5   :  { %2365 = vmatprep.mubr.bf16.mxu0 %v2197_v12 }
 0x2b6   :  { %2366 = vmatmul.mubr.bf16.vlgmr.msra.gmra.mxu0 %v2196_v13 }
 0x376   :  { %v2698_v14 = vpop.f32.mrf.mxu0 }
 0x378   :  { %v2699_v20 = vpop.f32.mrf.mxu0 }
 0x379   :  { %v2700_v18 = vadd.f32 %v2699_v20, %v2698_v14 }
 0x37a   :  { %v2701_v15 = vpop.f32.mrf.mxu0 }
 0x37b   :  { %v2368_v16 = vadd.f32 %v2700_v18, %v2665_v51 }
 0x37c   :  { %v2702_v17 = vpop.f32.mrf.mxu0 }
 0x37d   :  { %2373 = vst [vmem:[#allocation11] sm:$0xff] %v2368_v16 }
 0x37e   :  { %3252 = shalt.err (!%p3249_p1)
}
 0x37f   :  { %2383 = dma.vmem_to_hbm [thread:$0]  %s2381_s8, 128, %s3399_s7, [#allocation4]  }
 0x380   :  { %3267 = dma.done.wait [#allocation4], 128  }
 0x381   :  { %3268 = vsyncadd [#allocation4], 4294967168 }
 0x382   :  { %2387 = vsyncpa [#allocation3], 1 }
 0x383   :  { %2388 = vsyncpa [#allocation6], 1 }
 0x384   :  { %2389 = vsyncpa [#allocation9], 1 }
 0x385   :  { %2390 = vsyncpa [#allocation4], 1 }

</bundles_post_ra>
